<compile_context>
chip_gen: v6e
topology: v6e:2x2x1
jax: 0.10.0
libtpu: 0.0.40
codegen_flags: <defaults>
</compile_context>

<pallas_src>
import math
import functools

import jax
import jax.numpy as jnp
from jax import lax
from jax.experimental import pallas as pl
from jax.experimental.pallas import tpu as pltpu


# Off-centre 3x3 taps in (oy, ox) order; centre (0,0) handled separately.
_OFF_TAPS = ((-1, -1), (-1, 0), (-1, 1), (0, -1), (0, 1), (1, -1), (1, 0), (1, 1))


def _leaky(x, slope=0.2):
    return jnp.where(x >= 0, x, slope * x)


# ----------------------------------------------------------------------------
# Fused Convup kernel.  One grid step per batch-block of Bb images, everything
# in (C, L) lane-dense layout (C on sublanes, L = Bb*H*W on lanes).
# ----------------------------------------------------------------------------
def convup_kernel(x_ref, mask_ref, scal_ref, wqkv_ref, wo_ref, w1a_ref, w1x_ref,
                  w3c_ref, w3o_ref, w5_ref, o_ref, tap_ref, attn_ref,
                  *, c, h, w, bb):
    n = h * w
    ln = bb * n
    c2 = 2 * c
    bf16 = jnp.bfloat16

    x = x_ref[...]                                              # (C, L) f32

    # Packed per-channel scalars (gamma, beta, all biases) -------------------
    gamma = scal_ref[pl.ds(0, c), :]
    beta = scal_ref[pl.ds(c, c), :]
    bqkv = scal_ref[pl.ds(2 * c, 3 * c), :]
    bo = scal_ref[pl.ds(5 * c, c), :]
    b1 = scal_ref[pl.ds(6 * c, c2), :]
    b3 = scal_ref[pl.ds(8 * c, c2), :]
    b5 = scal_ref[pl.ds(10 * c, c), :]

    # ---- LayerNorm over channels (axis 0), torch defaults (eps=1e-5) -------
    mu = jnp.mean(x, axis=0, keepdims=True)
    var = jnp.mean((x - mu) ** 2, axis=0, keepdims=True)
    xn = (x - mu) * lax.rsqrt(var + 1e-5) * gamma + beta

    # ---- ESSAttn: fused q/k/v projection (one M=3C matmul, bf16 operands) --
    qkv = jnp.dot(wqkv_ref[...], xn.astype(bf16),
                  preferred_element_type=jnp.float32) + bqkv        # (3C, L)
    q = qkv[0:c]
    k = qkv[c:2 * c]
    v = qkv[2 * c:3 * c]

    q = q - jnp.mean(q, axis=0, keepdims=True)
    k = k - jnp.mean(k, axis=0, keepdims=True)
    q2 = q * q
    k2 = k * k
    q2 = q2 / (jnp.sum(q2, axis=0, keepdims=True) + 1e-7)
    k2 = k2 / (jnp.sum(k2, axis=0, keepdims=True) + 1e-7)
    # F.normalize(q2, dim=channel): L2 over the sublane (C) axis, per pixel.
    q2 = q2 / jnp.maximum(jnp.sqrt(jnp.sum(q2 * q2, axis=0, keepdims=True)), 1e-12)

    inv_sqrt_n = 1.0 / math.sqrt(n)
    # Per-image part: k2's L2 normalisation over the sequence axis plus the two
    # (C, C) contractions.  bb is small and static -> fully unrolled.
    for b in range(bb):
        lo, hi = b * n, (b + 1) * n
        k2b = k2[:, lo:hi]
        q2b = q2[:, lo:hi]
        vb = v[:, lo:hi]
        # F.normalize(k2, dim=sequence): L2 over the lane (N) axis, per image.
        k2b = k2b / jnp.maximum(
            jnp.sqrt(jnp.sum(k2b * k2b, axis=1, keepdims=True)), 1e-12)
        # kv[i, j] = sum_n k2b[i, n] * vb[j, n]   (== k2_nc^T @ v_nc)
        kv = lax.dot_general(k2b.astype(bf16), vb.astype(bf16),
                             (((1,), (1,)), ((), ())),
                             preferred_element_type=jnp.float32)     # (C, C)
        # t2_cn = kv^T @ q2_cn  (== transpose of q2_nc @ kv)
        t2 = lax.dot_general(kv.astype(bf16), q2b.astype(bf16),
                             (((0,), (0,)), ((), ())),
                             preferred_element_type=jnp.float32) * inv_sqrt_n
        attn_ref[:, pl.ds(lo, n)] = vb + t2

    a_out = jnp.dot(wo_ref[...], attn_ref[...].astype(bf16),
                    preferred_element_type=jnp.float32) + bo          # (C, L)

    # ---- convu: 1x1 -> LeakyReLU -> 3x3 -> LeakyReLU -> 1x1, + residual ----
    # Dropout2d == identity (eval).  xcat never materialised: w1 is split into
    # its attn-half (w1a) and shortcut-half (w1x).
    h1 = _leaky(jnp.dot(w1a_ref[...], a_out.astype(bf16),
                        preferred_element_type=jnp.float32)
                + jnp.dot(w1x_ref[...], x.astype(bf16),
                          preferred_element_type=jnp.float32)
                + b1)                                                 # (2C, L)

    # 3x3 conv (pad 1): centre tap straight from h1 (no copy), the 8 shifted
    # taps stored bf16 into a pre-allocated VMEM slab (no concatenate), with
    # hoisted boundary masks; then one K = 8*2C matmul.
    acc3 = jnp.dot(w3c_ref[...], h1.astype(bf16),
                   preferred_element_type=jnp.float32)                # (2C, L)
    for u, (oy, ox) in enumerate(_OFF_TAPS):
        off = oy * w + ox
        # shifted[:, i] = h1[:, (i + off) mod L]; any wrap (across the image or
        # across the neighbouring image in the batch block) is zeroed by mask.
        shifted = pltpu.roll(h1, (-off) % ln, axis=1)
        tap_ref[pl.ds(u * c2, c2), :] = (
            shifted * mask_ref[pl.ds(u, 1), :]).astype(bf16)
    h2 = _leaky(acc3 + jnp.dot(w3o_ref[...], tap_ref[...],
                               preferred_element_type=jnp.float32) + b3)

    out = jnp.dot(w5_ref[...], h2.astype(bf16),
                  preferred_element_type=jnp.float32) + b5            # (C, L)
    o_ref[...] = out + x


# ----------------------------------------------------------------------------
# Wrapper: host-side (one-time) weight re-layout + single pallas_call.
# ----------------------------------------------------------------------------
def _pick_batch_block(batch, max_bb=8):
    # Largest divisor of `batch` <= min(max_bb, batch // 2): keeps >=2 grid
    # steps when batch >= 2 (both v7x TensorCores busy) while amortising the
    # ~0.35 us per-step overhead for larger batches.
    bb = 1
    for d in range(1, min(max_bb, max(1, batch // 2)) + 1):
        if batch % d == 0:
            bb = d
    return bb


def convup_pallas(x_nchw, p, *, batch_block=None):
    B, C, H, W = x_nchw.shape
    N = H * W
    C2 = 2 * C
    assert N % 128 == 0, "H*W must be a multiple of 128 for lane-dense tiling"

    Bb = batch_block if batch_block is not None else _pick_batch_block(B)
    assert B % Bb == 0
    L = Bb * N
    G = B // Bb

    # Lane-dense (C, B*N) layout: channels on sublanes, batch*pixels on lanes.
    x_cn = jnp.transpose(x_nchw.reshape(B, C, N), (1, 0, 2)).reshape(C, B * N)

    # ---- hoisted 3x3 boundary masks (pure function of H, W; tiled per image)
    lane = jnp.arange(N, dtype=jnp.int32)
    row, col = lane // W, lane % W
    mrows = []
    for oy, ox in _OFF_TAPS:
        m = jnp.ones((N,), jnp.float32)
        if oy == -1:
            m = m * (row >= 1)
        if oy == 1:
            m = m * (row <= H - 2)
        if ox == -1:
            m = m * (col >= 1)
        if ox == 1:
            m = m * (col <= W - 2)
        mrows.append(m)
    masks = jnp.tile(jnp.stack(mrows, 0), (1, Bb))                    # (8, L)

    # ---- weights: bf16 MXU operands, consolidated ---------------------------
    bf16 = jnp.bfloat16
    wqkv = jnp.concatenate([p['wq'].T, p['wk'].T, p['wv'].T], 0).astype(bf16)
    wo = p['wo'].T.astype(bf16)                                       # (C, C)
    w1t = p['w1'].T                                                   # (2C, 2C)
    w1a = w1t[:, :C].astype(bf16)                                     # attn half
    w1x = w1t[:, C:].astype(bf16)                                     # shortcut half
    w3c = p['w3'][4].T.astype(bf16)                                   # centre tap
    off_idx = [(oy + 1) * 3 + (ox + 1) for oy, ox in _OFF_TAPS]
    w3o = jnp.transpose(jnp.stack([p['w3'][t] for t in off_idx]),
                        (2, 0, 1)).reshape(C2, 8 * C2).astype(bf16)   # (2C, 8*2C)
    w5 = p['w5'].T.astype(bf16)                                       # (C, 2C)
    # gamma/beta + every bias packed into one (11C, 1) f32 column.
    scal = jnp.concatenate([
        p['gamma'].reshape(C, 1), p['beta'].reshape(C, 1),
        p['bq'].reshape(C, 1), p['bk'].reshape(C, 1), p['bv'].reshape(C, 1),
        p['bo'].reshape(C, 1), p['b1'].reshape(C2, 1),
        p['b3'].reshape(C2, 1), p['b5'].reshape(C, 1)], 0).astype(jnp.float32)

    consts = (masks, scal, wqkv, wo, w1a, w1x, w3c, w3o, w5)

    def full(a):
        return pl.BlockSpec(a.shape, lambda g, _nd=a.ndim: (0,) * _nd)

    blk_spec = pl.BlockSpec((C, L), lambda g: (0, g))

    # VMEM budget: double-buffered in/out blocks + bf16 tap slab + attention
    # scratch + in-flight temporaries + weights; clamped to <=48 MiB so the
    # plan also fits v7x's 64 MiB physical VMEM (v5e/v6e have 128 MiB).
    blk_bytes = C * L * 4
    w_bytes = sum(int(a.size) * a.dtype.itemsize for a in consts)
    est = (4 * blk_bytes                  # 2x double-buffered (C, L) blocks
           + 8 * C2 * L * 2 + blk_bytes   # tap slab (bf16) + attn scratch
           + 12 * C2 * L * 4              # live temporaries (qkv, h1, h2, ...)
           + w_bytes)
    vmem_limit = int(min(48 << 20, max(32 << 20, 2 * est)))

    call = pl.pallas_call(
        functools.partial(convup_kernel, c=C, h=H, w=W, bb=Bb),
        out_shape=jax.ShapeDtypeStruct((C, B * N), jnp.float32),
        grid=(G,),
        in_specs=[blk_spec] + [full(a) for a in consts],
        out_specs=blk_spec,
        scratch_shapes=[pltpu.VMEM((8 * C2, L), bf16),      # 3x3 tap slab
                        pltpu.VMEM((C, L), jnp.float32)],   # attn (= v + t2)
        compiler_params=pltpu.CompilerParams(
            dimension_semantics=("parallel",),     # batch blocks independent
            vmem_limit_bytes=vmem_limit),
    )
    out = call(x_cn, *consts)
    return jnp.transpose(out.reshape(C, B, N), (1, 0, 2)).reshape(B, C, H, W)


# ----------------------------------------------------------------------------
# Pure-JAX reference (faithful to the PyTorch module) for verification.
# ----------------------------------------------------------------------------
def convup_ref(x_nchw, p):
    B, C, H, W = x_nchw.shape
    N = H * W
    C2 = 2 * C
    x_seq = jnp.transpose(x_nchw, (0, 2, 3, 1)).reshape(B, N, C)

    mu = jnp.mean(x_seq, -1, keepdims=True)
    var = jnp.mean((x_seq - mu) ** 2, -1, keepdims=True)
    xn = (x_seq - mu) / jnp.sqrt(var + 1e-5) * p['gamma'][0] + p['beta'][0]

    q = xn @ p['wq'] + p['bq'][0]
    k = xn @ p['wk'] + p['bk'][0]
    v = xn @ p['wv'] + p['bv'][0]
    q = q - jnp.mean(q, -1, keepdims=True)
    k = k - jnp.mean(k, -1, keepdims=True)
    q2, k2 = q * q, k * k
    q2s = jnp.sum(q2, -1, keepdims=True)
    k2s = jnp.sum(k2, -1, keepdims=True)
    k2 = k2 / (k2s + 1e-7)
    k2 = k2 / jnp.maximum(jnp.sqrt(jnp.sum(k2 * k2, axis=-2, keepdims=True)), 1e-12)
    q2 = q2 / (q2s + 1e-7)
    q2 = q2 / jnp.maximum(jnp.sqrt(jnp.sum(q2 * q2, axis=-1, keepdims=True)), 1e-12)
    t2 = q2 @ (jnp.swapaxes(k2, -2, -1) @ v) / math.sqrt(N)
    a_out = (v + t2) @ p['wo'] + p['bo'][0]

    xcat = jnp.concatenate([a_out, x_seq], -1)
    h1 = _leaky(xcat @ p['w1'] + p['b1'][0]).reshape(B, H, W, C2)
    pad = jnp.pad(h1, ((0, 0), (1, 1), (1, 1), (0, 0)))
    acc = jnp.zeros((B, N, C2), jnp.float32)
    for dy in range(3):
        for dx in range(3):
            win = pad[:, dy:dy + H, dx:dx + W, :].reshape(B, N, C2)
            acc = acc + win @ p['w3'][dy * 3 + dx]
    h2 = _leaky(acc + p['b3'][0])
    out = h2 @ p['w5'] + p['b5'][0] + x_seq
    return out.reshape(B, H, W, C).transpose(0, 3, 1, 2)


def init_params(key, dim):
    C, C2 = dim, 2 * dim
    ks = jax.random.split(key, 16)

    def w(k, shape, scale=0.2):
        return scale * jax.random.normal(k, shape, jnp.float32)

    return dict(
        gamma=1.0 + 0.1 * jax.random.normal(ks[0], (1, C), jnp.float32),
        beta=0.1 * jax.random.normal(ks[1], (1, C), jnp.float32),
        wq=w(ks[2], (C, C)), bq=w(ks[3], (1, C), 0.05),
        wk=w(ks[4], (C, C)), bk=w(ks[5], (1, C), 0.05),
        wv=w(ks[6], (C, C)), bv=w(ks[7], (1, C), 0.05),
        wo=w(ks[8], (C, C)), bo=w(ks[9], (1, C), 0.05),
        w1=w(ks[10], (C2, C2)), b1=w(ks[11], (1, C2), 0.05),
        w3=w(ks[12], (9, C2, C2), 0.1), b3=w(ks[13], (1, C2), 0.05),
        w5=w(ks[14], (C2, C)), b5=w(ks[15], (1, C), 0.05),
    )


if __name__ == "__main__":
    # TODO(synk): Dropout2d layers are stochastic in training mode; modeled as
    # identity here (inference / eval semantics).
    key = jax.random.PRNGKey(0)
    kx, kp = jax.random.split(key)
    B, dim, H, W = 2, 8, 16, 16
    x = jax.random.normal(kx, (B, dim, H, W), jnp.float32)     # NCHW (PyTorch conv.)
    params = init_params(kp, dim)

    out = jax.jit(convup_pallas)(x, params)
    out = jax.block_until_ready(out)

    ref = convup_ref(x, params)
    assert out.shape == (B, dim, H, W)
    err = float(jnp.max(jnp.abs(out - ref)))
    # bf16 MXU operands (f32 accumulate) vs pure-f32 reference -> 2e-2 budget.
    assert err < 2e-2, f"max abs error {err}"
    print("KERNEL_OK")
</pallas_src>

<mosaic_0001>
module attributes {stable_mosaic.version = 11 : i64} {
  func.func @convup_kernel(%arg0: i32, %arg1: memref<8x256xf32, #tpu.memory_space<vmem>>, %arg2: memref<8x256xf32, #tpu.memory_space<vmem>>, %arg3: memref<88x1xf32, #tpu.memory_space<vmem>>, %arg4: memref<24x8xbf16, #tpu.memory_space<vmem>>, %arg5: memref<8x8xbf16, #tpu.memory_space<vmem>>, %arg6: memref<16x8xbf16, #tpu.memory_space<vmem>>, %arg7: memref<16x8xbf16, #tpu.memory_space<vmem>>, %arg8: memref<16x16xbf16, #tpu.memory_space<vmem>>, %arg9: memref<16x128xbf16, #tpu.memory_space<vmem>>, %arg10: memref<8x16xbf16, #tpu.memory_space<vmem>>, %arg11: memref<8x256xf32, #tpu.memory_space<vmem>>, %arg12: memref<128x256xbf16, #tpu.memory_space<vmem>>, %arg13: memref<8x256xf32, #tpu.memory_space<vmem>>) attributes {dimension_semantics = [#tpu.dimension_semantics<parallel>], iteration_bounds = array<i64: 2>, scalar_prefetch = 0 : i64, scratch_operands = 2 : i64, tpu.core_type = #tpu.core_type<tc>, window_params = [{transform_indices = @transform_0, window_bounds = array<i64: 8, 256>}, {pipeline_mode = #tpu.pipeline_mode<synchronous>, transform_indices = @transform_1, window_bounds = array<i64: 8, 256>}, {pipeline_mode = #tpu.pipeline_mode<synchronous>, transform_indices = @transform_2, window_bounds = array<i64: 88, 1>}, {pipeline_mode = #tpu.pipeline_mode<synchronous>, transform_indices = @transform_3, window_bounds = array<i64: 24, 8>}, {pipeline_mode = #tpu.pipeline_mode<synchronous>, transform_indices = @transform_4, window_bounds = array<i64: 8, 8>}, {pipeline_mode = #tpu.pipeline_mode<synchronous>, transform_indices = @transform_5, window_bounds = array<i64: 16, 8>}, {pipeline_mode = #tpu.pipeline_mode<synchronous>, transform_indices = @transform_6, window_bounds = array<i64: 16, 8>}, {pipeline_mode = #tpu.pipeline_mode<synchronous>, transform_indices = @transform_7, window_bounds = array<i64: 16, 16>}, {pipeline_mode = #tpu.pipeline_mode<synchronous>, transform_indices = @transform_8, window_bounds = array<i64: 16, 128>}, {pipeline_mode = #tpu.pipeline_mode<synchronous>, transform_indices = @transform_9, window_bounds = array<i64: 8, 16>}, {transform_indices = @transform_10, window_bounds = array<i64: 8, 256>}]} {
    %c0 = arith.constant 0 : index
    %c0_0 = arith.constant 0 : index
    %0 = vector.load %arg1[%c0, %c0_0] : memref<8x256xf32, #tpu.memory_space<vmem>>, vector<8x256xf32>
    %c0_1 = arith.constant 0 : index
    %c0_2 = arith.constant 0 : index
    %1 = vector.load %arg3[%c0_1, %c0_2] : memref<88x1xf32, #tpu.memory_space<vmem>>, vector<8x1xf32>
    %c8 = arith.constant 8 : index
    %c0_3 = arith.constant 0 : index
    %2 = vector.load %arg3[%c8, %c0_3] : memref<88x1xf32, #tpu.memory_space<vmem>>, vector<8x1xf32>
    %c16 = arith.constant 16 : index
    %c0_4 = arith.constant 0 : index
    %3 = vector.load %arg3[%c16, %c0_4] : memref<88x1xf32, #tpu.memory_space<vmem>>, vector<24x1xf32>
    %c40 = arith.constant 40 : index
    %c0_5 = arith.constant 0 : index
    %4 = vector.load %arg3[%c40, %c0_5] : memref<88x1xf32, #tpu.memory_space<vmem>>, vector<8x1xf32>
    %c48 = arith.constant 48 : index
    %c0_6 = arith.constant 0 : index
    %5 = vector.load %arg3[%c48, %c0_6] : memref<88x1xf32, #tpu.memory_space<vmem>>, vector<16x1xf32>
    %c64 = arith.constant 64 : index
    %c0_7 = arith.constant 0 : index
    %6 = vector.load %arg3[%c64, %c0_7] : memref<88x1xf32, #tpu.memory_space<vmem>>, vector<16x1xf32>
    %c80 = arith.constant 80 : index
    %c0_8 = arith.constant 0 : index
    %7 = vector.load %arg3[%c80, %c0_8] : memref<88x1xf32, #tpu.memory_space<vmem>>, vector<8x1xf32>
    %cst = arith.constant dense<0.000000e+00> : vector<256xf32>
    %8 = vector.multi_reduction <add>, %0, %cst [0] : vector<8x256xf32> to vector<256xf32>
    %9 = vector.shape_cast %8 : vector<256xf32> to vector<1x256xf32>
    %cst_9 = arith.constant 8.000000e+00 : f32
    %10 = vector.broadcast %cst_9 : f32 to vector<1x256xf32>
    %11 = arith.divf %9, %10 : vector<1x256xf32>
    %12 = vector.broadcast %11 : vector<1x256xf32> to vector<8x256xf32>
    %13 = arith.subf %0, %12 : vector<8x256xf32>
    %14 = arith.mulf %13, %13 : vector<8x256xf32>
    %cst_10 = arith.constant dense<0.000000e+00> : vector<256xf32>
    %15 = vector.multi_reduction <add>, %14, %cst_10 [0] : vector<8x256xf32> to vector<256xf32>
    %16 = vector.shape_cast %15 : vector<256xf32> to vector<1x256xf32>
    %cst_11 = arith.constant 8.000000e+00 : f32
    %17 = vector.broadcast %cst_11 : f32 to vector<1x256xf32>
    %18 = arith.divf %16, %17 : vector<1x256xf32>
    %19 = vector.broadcast %11 : vector<1x256xf32> to vector<8x256xf32>
    %20 = arith.subf %0, %19 : vector<8x256xf32>
    %cst_12 = arith.constant 9.99999974E-6 : f32
    %21 = vector.broadcast %cst_12 : f32 to vector<1x256xf32>
    %22 = arith.addf %18, %21 : vector<1x256xf32>
    %23 = math.rsqrt %22 : vector<1x256xf32>
    %24 = vector.broadcast %23 : vector<1x256xf32> to vector<8x256xf32>
    %25 = arith.mulf %20, %24 : vector<8x256xf32>
    %26 = vector.broadcast %1 : vector<8x1xf32> to vector<8x256xf32>
    %27 = arith.mulf %25, %26 : vector<8x256xf32>
    %28 = vector.broadcast %2 : vector<8x1xf32> to vector<8x256xf32>
    %29 = arith.addf %27, %28 : vector<8x256xf32>
    %c0_13 = arith.constant 0 : index
    %c0_14 = arith.constant 0 : index
    %30 = vector.load %arg4[%c0_13, %c0_14] : memref<24x8xbf16, #tpu.memory_space<vmem>>, vector<24x8xbf16>
    %31 = arith.truncf %29 : vector<8x256xf32> to vector<8x256xbf16>
    %cst_15 = arith.constant dense<0.000000e+00> : vector<24x256xf32>
    %32 = tpu.matmul %30, %31, %cst_15 {dimension_numbers = #tpu.dot_dimension_numbers<[1], [0], [0], [1], [0, 0, 1, 1], [], []>} : vector<24x8xbf16>, vector<8x256xbf16>, vector<24x256xf32> -> vector<24x256xf32>
    %33 = vector.broadcast %3 : vector<24x1xf32> to vector<24x256xf32>
    %34 = arith.addf %32, %33 : vector<24x256xf32>
    %35 = vector.extract_strided_slice %34 {offsets = [0, 0], sizes = [8, 256], strides = [1, 1]} : vector<24x256xf32> to vector<8x256xf32>
    %36 = vector.extract_strided_slice %34 {offsets = [8, 0], sizes = [8, 256], strides = [1, 1]} : vector<24x256xf32> to vector<8x256xf32>
    %37 = vector.extract_strided_slice %34 {offsets = [16, 0], sizes = [8, 256], strides = [1, 1]} : vector<24x256xf32> to vector<8x256xf32>
    %cst_16 = arith.constant dense<0.000000e+00> : vector<256xf32>
    %38 = vector.multi_reduction <add>, %35, %cst_16 [0] : vector<8x256xf32> to vector<256xf32>
    %39 = vector.shape_cast %38 : vector<256xf32> to vector<1x256xf32>
    %cst_17 = arith.constant 8.000000e+00 : f32
    %40 = vector.broadcast %cst_17 : f32 to vector<1x256xf32>
    %41 = arith.divf %39, %40 : vector<1x256xf32>
    %42 = vector.broadcast %41 : vector<1x256xf32> to vector<8x256xf32>
    %43 = arith.subf %35, %42 : vector<8x256xf32>
    %cst_18 = arith.constant dense<0.000000e+00> : vector<256xf32>
    %44 = vector.multi_reduction <add>, %36, %cst_18 [0] : vector<8x256xf32> to vector<256xf32>
    %45 = vector.shape_cast %44 : vector<256xf32> to vector<1x256xf32>
    %cst_19 = arith.constant 8.000000e+00 : f32
    %46 = vector.broadcast %cst_19 : f32 to vector<1x256xf32>
    %47 = arith.divf %45, %46 : vector<1x256xf32>
    %48 = vector.broadcast %47 : vector<1x256xf32> to vector<8x256xf32>
    %49 = arith.subf %36, %48 : vector<8x256xf32>
    %50 = arith.mulf %43, %43 : vector<8x256xf32>
    %51 = arith.mulf %49, %49 : vector<8x256xf32>
    %cst_20 = arith.constant dense<0.000000e+00> : vector<256xf32>
    %52 = vector.multi_reduction <add>, %50, %cst_20 [0] : vector<8x256xf32> to vector<256xf32>
    %53 = vector.shape_cast %52 : vector<256xf32> to vector<1x256xf32>
    %cst_21 = arith.constant 1.000000e-07 : f32
    %54 = vector.broadcast %cst_21 : f32 to vector<1x256xf32>
    %55 = arith.addf %53, %54 : vector<1x256xf32>
    %56 = vector.broadcast %55 : vector<1x256xf32> to vector<8x256xf32>
    %57 = arith.divf %50, %56 : vector<8x256xf32>
    %cst_22 = arith.constant dense<0.000000e+00> : vector<256xf32>
    %58 = vector.multi_reduction <add>, %51, %cst_22 [0] : vector<8x256xf32> to vector<256xf32>
    %59 = vector.shape_cast %58 : vector<256xf32> to vector<1x256xf32>
    %cst_23 = arith.constant 1.000000e-07 : f32
    %60 = vector.broadcast %cst_23 : f32 to vector<1x256xf32>
    %61 = arith.addf %59, %60 : vector<1x256xf32>
    %62 = vector.broadcast %61 : vector<1x256xf32> to vector<8x256xf32>
    %63 = arith.divf %51, %62 : vector<8x256xf32>
    %64 = arith.mulf %57, %57 : vector<8x256xf32>
    %cst_24 = arith.constant dense<0.000000e+00> : vector<256xf32>
    %65 = vector.multi_reduction <add>, %64, %cst_24 [0] : vector<8x256xf32> to vector<256xf32>
    %66 = vector.shape_cast %65 : vector<256xf32> to vector<1x256xf32>
    %67 = math.sqrt %66 : vector<1x256xf32>
    %cst_25 = arith.constant 9.99999996E-13 : f32
    %68 = vector.broadcast %cst_25 : f32 to vector<1x256xf32>
    %69 = arith.maximumf %67, %68 : vector<1x256xf32>
    %70 = vector.broadcast %69 : vector<1x256xf32> to vector<8x256xf32>
    %71 = arith.divf %57, %70 : vector<8x256xf32>
    %72 = arith.mulf %63, %63 : vector<8x256xf32>
    %cst_26 = arith.constant dense<0.000000e+00> : vector<8xf32>
    %73 = vector.multi_reduction <add>, %72, %cst_26 [1] : vector<8x256xf32> to vector<8xf32>
    %74 = vector.shape_cast %73 : vector<8xf32> to vector<8x1xf32>
    %75 = math.sqrt %74 : vector<8x1xf32>
    %cst_27 = arith.constant 9.99999996E-13 : f32
    %76 = vector.broadcast %cst_27 : f32 to vector<8x1xf32>
    %77 = arith.maximumf %75, %76 : vector<8x1xf32>
    %78 = vector.broadcast %77 : vector<8x1xf32> to vector<8x256xf32>
    %79 = arith.divf %63, %78 : vector<8x256xf32>
    %80 = arith.truncf %79 : vector<8x256xf32> to vector<8x256xbf16>
    %81 = arith.truncf %37 : vector<8x256xf32> to vector<8x256xbf16>
    %cst_28 = arith.constant dense<0.000000e+00> : vector<8x8xf32>
    %82 = tpu.matmul %80, %81, %cst_28 {dimension_numbers = #tpu.dot_dimension_numbers<[1], [1], [0], [0], [0, 0, 1, 0], [], []>} : vector<8x256xbf16>, vector<8x256xbf16>, vector<8x8xf32> -> vector<8x8xf32>
    %83 = arith.truncf %82 : vector<8x8xf32> to vector<8x8xbf16>
    %84 = arith.truncf %71 : vector<8x256xf32> to vector<8x256xbf16>
    %cst_29 = arith.constant dense<0.000000e+00> : vector<8x256xf32>
    %85 = tpu.matmul %83, %84, %cst_29 {dimension_numbers = #tpu.dot_dimension_numbers<[0], [0], [1], [1], [0, 1, 1, 1], [], []>} : vector<8x8xbf16>, vector<8x256xbf16>, vector<8x256xf32> -> vector<8x256xf32>
    %cst_30 = arith.constant 6.250000e-02 : f32
    %86 = vector.broadcast %cst_30 : f32 to vector<8x256xf32>
    %87 = arith.mulf %85, %86 : vector<8x256xf32>
    %88 = arith.addf %37, %87 : vector<8x256xf32>
    %c0_31 = arith.constant 0 : index
    %c0_32 = arith.constant 0 : index
    %89 = vector.load %arg13[%c0_31, %c0_32] : memref<8x256xf32, #tpu.memory_space<vmem>>, vector<8x256xf32>
    tpu.vector_store %arg13[%c0_31, %c0_32], %88 {strides = array<i32>} : memref<8x256xf32, #tpu.memory_space<vmem>>, vector<8x256xf32>,
    %c0_33 = arith.constant 0 : index
    %c0_34 = arith.constant 0 : index
    %90 = vector.load %arg5[%c0_33, %c0_34] : memref<8x8xbf16, #tpu.memory_space<vmem>>, vector<8x8xbf16>
    %c0_35 = arith.constant 0 : index
    %c0_36 = arith.constant 0 : index
    %91 = vector.load %arg13[%c0_35, %c0_36] : memref<8x256xf32, #tpu.memory_space<vmem>>, vector<8x256xf32>
    %92 = arith.truncf %91 : vector<8x256xf32> to vector<8x256xbf16>
    %cst_37 = arith.constant dense<0.000000e+00> : vector<8x256xf32>
    %93 = tpu.matmul %90, %92, %cst_37 {dimension_numbers = #tpu.dot_dimension_numbers<[1], [0], [0], [1], [0, 0, 1, 1], [], []>} : vector<8x8xbf16>, vector<8x256xbf16>, vector<8x256xf32> -> vector<8x256xf32>
    %94 = vector.broadcast %4 : vector<8x1xf32> to vector<8x256xf32>
    %95 = arith.addf %93, %94 : vector<8x256xf32>
    %c0_38 = arith.constant 0 : index
    %c0_39 = arith.constant 0 : index
    %96 = vector.load %arg6[%c0_38, %c0_39] : memref<16x8xbf16, #tpu.memory_space<vmem>>, vector<16x8xbf16>
    %97 = arith.truncf %95 : vector<8x256xf32> to vector<8x256xbf16>
    %cst_40 = arith.constant dense<0.000000e+00> : vector<16x256xf32>
    %98 = tpu.matmul %96, %97, %cst_40 {dimension_numbers = #tpu.dot_dimension_numbers<[1], [0], [0], [1], [0, 0, 1, 1], [], []>} : vector<16x8xbf16>, vector<8x256xbf16>, vector<16x256xf32> -> vector<16x256xf32>
    %c0_41 = arith.constant 0 : index
    %c0_42 = arith.constant 0 : index
    %99 = vector.load %arg7[%c0_41, %c0_42] : memref<16x8xbf16, #tpu.memory_space<vmem>>, vector<16x8xbf16>
    %100 = arith.truncf %0 : vector<8x256xf32> to vector<8x256xbf16>
    %cst_43 = arith.constant dense<0.000000e+00> : vector<16x256xf32>
    %101 = tpu.matmul %99, %100, %cst_43 {dimension_numbers = #tpu.dot_dimension_numbers<[1], [0], [0], [1], [0, 0, 1, 1], [], []>} : vector<16x8xbf16>, vector<8x256xbf16>, vector<16x256xf32> -> vector<16x256xf32>
    %102 = arith.addf %98, %101 : vector<16x256xf32>
    %103 = vector.broadcast %5 : vector<16x1xf32> to vector<16x256xf32>
    %104 = arith.addf %102, %103 : vector<16x256xf32>
    %cst_44 = arith.constant 0.000000e+00 : f32
    %105 = vector.broadcast %cst_44 : f32 to vector<16x256xf32>
    %106 = arith.cmpf oge, %104, %105 : vector<16x256xf32>
    %cst_45 = arith.constant 2.000000e-01 : f32
    %107 = vector.broadcast %cst_45 : f32 to vector<16x256xf32>
    %108 = arith.mulf %107, %104 : vector<16x256xf32>
    %109 = arith.select %106, %104, %108 : vector<16x256xi1>, vector<16x256xf32>
    %c0_46 = arith.constant 0 : index
    %c0_47 = arith.constant 0 : index
    %110 = vector.load %arg8[%c0_46, %c0_47] : memref<16x16xbf16, #tpu.memory_space<vmem>>, vector<16x16xbf16>
    %111 = arith.truncf %109 : vector<16x256xf32> to vector<16x256xbf16>
    %cst_48 = arith.constant dense<0.000000e+00> : vector<16x256xf32>
    %112 = tpu.matmul %110, %111, %cst_48 {dimension_numbers = #tpu.dot_dimension_numbers<[1], [0], [0], [1], [0, 0, 1, 1], [], []>} : vector<16x16xbf16>, vector<16x256xbf16>, vector<16x256xf32> -> vector<16x256xf32>
    %c17_i32 = arith.constant 17 : i32
    %113 = tpu.dynamic_rotate %109 by %c17_i32 dim 1 : vector<16x256xf32>, i32 -> vector<16x256xf32>
    %c0_49 = arith.constant 0 : index
    %c0_50 = arith.constant 0 : index
    %114 = vector.load %arg2[%c0_49, %c0_50] : memref<8x256xf32, #tpu.memory_space<vmem>>, vector<1x256xf32>
    %115 = vector.broadcast %114 : vector<1x256xf32> to vector<16x256xf32>
    %116 = arith.mulf %113, %115 : vector<16x256xf32>
    %117 = arith.truncf %116 : vector<16x256xf32> to vector<16x256xbf16>
    %c0_51 = arith.constant 0 : index
    %c0_52 = arith.constant 0 : index
    %118 = vector.load %arg12[%c0_51, %c0_52] : memref<128x256xbf16, #tpu.memory_space<vmem>>, vector<16x256xbf16>
    tpu.vector_store %arg12[%c0_51, %c0_52], %117 {strides = array<i32>} : memref<128x256xbf16, #tpu.memory_space<vmem>>, vector<16x256xbf16>,
    %c16_i32 = arith.constant 16 : i32
    %119 = tpu.dynamic_rotate %109 by %c16_i32 dim 1 : vector<16x256xf32>, i32 -> vector<16x256xf32>
    %c1 = arith.constant 1 : index
    %c0_53 = arith.constant 0 : index
    %120 = vector.load %arg2[%c1, %c0_53] : memref<8x256xf32, #tpu.memory_space<vmem>>, vector<1x256xf32>
    %121 = vector.broadcast %120 : vector<1x256xf32> to vector<16x256xf32>
    %122 = arith.mulf %119, %121 : vector<16x256xf32>
    %123 = arith.truncf %122 : vector<16x256xf32> to vector<16x256xbf16>
    %c16_54 = arith.constant 16 : index
    %c0_55 = arith.constant 0 : index
    %124 = vector.load %arg12[%c16_54, %c0_55] : memref<128x256xbf16, #tpu.memory_space<vmem>>, vector<16x256xbf16>
    tpu.vector_store %arg12[%c16_54, %c0_55], %123 {strides = array<i32>} : memref<128x256xbf16, #tpu.memory_space<vmem>>, vector<16x256xbf16>,
    %c15_i32 = arith.constant 15 : i32
    %125 = tpu.dynamic_rotate %109 by %c15_i32 dim 1 : vector<16x256xf32>, i32 -> vector<16x256xf32>
    %c2 = arith.constant 2 : index
    %c0_56 = arith.constant 0 : index
    %126 = vector.load %arg2[%c2, %c0_56] : memref<8x256xf32, #tpu.memory_space<vmem>>, vector<1x256xf32>
    %127 = vector.broadcast %126 : vector<1x256xf32> to vector<16x256xf32>
    %128 = arith.mulf %125, %127 : vector<16x256xf32>
    %129 = arith.truncf %128 : vector<16x256xf32> to vector<16x256xbf16>
    %c32 = arith.constant 32 : index
    %c0_57 = arith.constant 0 : index
    %130 = vector.load %arg12[%c32, %c0_57] : memref<128x256xbf16, #tpu.memory_space<vmem>>, vector<16x256xbf16>
    tpu.vector_store %arg12[%c32, %c0_57], %129 {strides = array<i32>} : memref<128x256xbf16, #tpu.memory_space<vmem>>, vector<16x256xbf16>,
    %c1_i32 = arith.constant 1 : i32
    %131 = tpu.dynamic_rotate %109 by %c1_i32 dim 1 : vector<16x256xf32>, i32 -> vector<16x256xf32>
    %c3 = arith.constant 3 : index
    %c0_58 = arith.constant 0 : index
    %132 = vector.load %arg2[%c3, %c0_58] : memref<8x256xf32, #tpu.memory_space<vmem>>, vector<1x256xf32>
    %133 = vector.broadcast %132 : vector<1x256xf32> to vector<16x256xf32>
    %134 = arith.mulf %131, %133 : vector<16x256xf32>
    %135 = arith.truncf %134 : vector<16x256xf32> to vector<16x256xbf16>
    %c48_59 = arith.constant 48 : index
    %c0_60 = arith.constant 0 : index
    %136 = vector.load %arg12[%c48_59, %c0_60] : memref<128x256xbf16, #tpu.memory_space<vmem>>, vector<16x256xbf16>
    tpu.vector_store %arg12[%c48_59, %c0_60], %135 {strides = array<i32>} : memref<128x256xbf16, #tpu.memory_space<vmem>>, vector<16x256xbf16>,
    %c255_i32 = arith.constant 255 : i32
    %137 = tpu.dynamic_rotate %109 by %c255_i32 dim 1 : vector<16x256xf32>, i32 -> vector<16x256xf32>
    %c4 = arith.constant 4 : index
    %c0_61 = arith.constant 0 : index
    %138 = vector.load %arg2[%c4, %c0_61] : memref<8x256xf32, #tpu.memory_space<vmem>>, vector<1x256xf32>
    %139 = vector.broadcast %138 : vector<1x256xf32> to vector<16x256xf32>
    %140 = arith.mulf %137, %139 : vector<16x256xf32>
    %141 = arith.truncf %140 : vector<16x256xf32> to vector<16x256xbf16>
    %c64_62 = arith.constant 64 : index
    %c0_63 = arith.constant 0 : index
    %142 = vector.load %arg12[%c64_62, %c0_63] : memref<128x256xbf16, #tpu.memory_space<vmem>>, vector<16x256xbf16>
    tpu.vector_store %arg12[%c64_62, %c0_63], %141 {strides = array<i32>} : memref<128x256xbf16, #tpu.memory_space<vmem>>, vector<16x256xbf16>,
    %c241_i32 = arith.constant 241 : i32
    %143 = tpu.dynamic_rotate %109 by %c241_i32 dim 1 : vector<16x256xf32>, i32 -> vector<16x256xf32>
    %c5 = arith.constant 5 : index
    %c0_64 = arith.constant 0 : index
    %144 = vector.load %arg2[%c5, %c0_64] : memref<8x256xf32, #tpu.memory_space<vmem>>, vector<1x256xf32>
    %145 = vector.broadcast %144 : vector<1x256xf32> to vector<16x256xf32>
    %146 = arith.mulf %143, %145 : vector<16x256xf32>
    %147 = arith.truncf %146 : vector<16x256xf32> to vector<16x256xbf16>
    %c80_65 = arith.constant 80 : index
    %c0_66 = arith.constant 0 : index
    %148 = vector.load %arg12[%c80_65, %c0_66] : memref<128x256xbf16, #tpu.memory_space<vmem>>, vector<16x256xbf16>
    tpu.vector_store %arg12[%c80_65, %c0_66], %147 {strides = array<i32>} : memref<128x256xbf16, #tpu.memory_space<vmem>>, vector<16x256xbf16>,
    %c240_i32 = arith.constant 240 : i32
    %149 = tpu.dynamic_rotate %109 by %c240_i32 dim 1 : vector<16x256xf32>, i32 -> vector<16x256xf32>
    %c6 = arith.constant 6 : index
    %c0_67 = arith.constant 0 : index
    %150 = vector.load %arg2[%c6, %c0_67] : memref<8x256xf32, #tpu.memory_space<vmem>>, vector<1x256xf32>
    %151 = vector.broadcast %150 : vector<1x256xf32> to vector<16x256xf32>
    %152 = arith.mulf %149, %151 : vector<16x256xf32>
    %153 = arith.truncf %152 : vector<16x256xf32> to vector<16x256xbf16>
    %c96 = arith.constant 96 : index
    %c0_68 = arith.constant 0 : index
    %154 = vector.load %arg12[%c96, %c0_68] : memref<128x256xbf16, #tpu.memory_space<vmem>>, vector<16x256xbf16>
    tpu.vector_store %arg12[%c96, %c0_68], %153 {strides = array<i32>} : memref<128x256xbf16, #tpu.memory_space<vmem>>, vector<16x256xbf16>,
    %c239_i32 = arith.constant 239 : i32
    %155 = tpu.dynamic_rotate %109 by %c239_i32 dim 1 : vector<16x256xf32>, i32 -> vector<16x256xf32>
    %c7 = arith.constant 7 : index
    %c0_69 = arith.constant 0 : index
    %156 = vector.load %arg2[%c7, %c0_69] : memref<8x256xf32, #tpu.memory_space<vmem>>, vector<1x256xf32>
    %157 = vector.broadcast %156 : vector<1x256xf32> to vector<16x256xf32>
    %158 = arith.mulf %155, %157 : vector<16x256xf32>
    %159 = arith.truncf %158 : vector<16x256xf32> to vector<16x256xbf16>
    %c112 = arith.constant 112 : index
    %c0_70 = arith.constant 0 : index
    %160 = vector.load %arg12[%c112, %c0_70] : memref<128x256xbf16, #tpu.memory_space<vmem>>, vector<16x256xbf16>
    tpu.vector_store %arg12[%c112, %c0_70], %159 {strides = array<i32>} : memref<128x256xbf16, #tpu.memory_space<vmem>>, vector<16x256xbf16>,
    %c0_71 = arith.constant 0 : index
    %c0_72 = arith.constant 0 : index
    %161 = vector.load %arg9[%c0_71, %c0_72] : memref<16x128xbf16, #tpu.memory_space<vmem>>, vector<16x128xbf16>
    %c0_73 = arith.constant 0 : index
    %c0_74 = arith.constant 0 : index
    %162 = vector.load %arg12[%c0_73, %c0_74] : memref<128x256xbf16, #tpu.memory_space<vmem>>, vector<128x256xbf16>
    %cst_75 = arith.constant dense<0.000000e+00> : vector<16x256xf32>
    %163 = tpu.matmul %161, %162, %cst_75 {dimension_numbers = #tpu.dot_dimension_numbers<[1], [0], [0], [1], [0, 0, 1, 1], [], []>} : vector<16x128xbf16>, vector<128x256xbf16>, vector<16x256xf32> -> vector<16x256xf32>
    %164 = arith.addf %112, %163 : vector<16x256xf32>
    %165 = vector.broadcast %6 : vector<16x1xf32> to vector<16x256xf32>
    %166 = arith.addf %164, %165 : vector<16x256xf32>
    %cst_76 = arith.constant 0.000000e+00 : f32
    %167 = vector.broadcast %cst_76 : f32 to vector<16x256xf32>
    %168 = arith.cmpf oge, %166, %167 : vector<16x256xf32>
    %cst_77 = arith.constant 2.000000e-01 : f32
    %169 = vector.broadcast %cst_77 : f32 to vector<16x256xf32>
    %170 = arith.mulf %169, %166 : vector<16x256xf32>
    %171 = arith.select %168, %166, %170 : vector<16x256xi1>, vector<16x256xf32>
    %c0_78 = arith.constant 0 : index
    %c0_79 = arith.constant 0 : index
    %172 = vector.load %arg10[%c0_78, %c0_79] : memref<8x16xbf16, #tpu.memory_space<vmem>>, vector<8x16xbf16>
    %173 = arith.truncf %171 : vector<16x256xf32> to vector<16x256xbf16>
    %cst_80 = arith.constant dense<0.000000e+00> : vector<8x256xf32>
    %174 = tpu.matmul %172, %173, %cst_80 {dimension_numbers = #tpu.dot_dimension_numbers<[1], [0], [0], [1], [0, 0, 1, 1], [], []>} : vector<8x16xbf16>, vector<16x256xbf16>, vector<8x256xf32> -> vector<8x256xf32>
    %175 = vector.broadcast %7 : vector<8x1xf32> to vector<8x256xf32>
    %176 = arith.addf %174, %175 : vector<8x256xf32>
    %177 = arith.addf %176, %0 : vector<8x256xf32>
    %c0_81 = arith.constant 0 : index
    %c0_82 = arith.constant 0 : index
    %178 = vector.load %arg11[%c0_81, %c0_82] : memref<8x256xf32, #tpu.memory_space<vmem>>, vector<8x256xf32>
    tpu.vector_store %arg11[%c0_81, %c0_82], %177 {strides = array<i32>} : memref<8x256xf32, #tpu.memory_space<vmem>>, vector<8x256xf32>,
    return
  }
  func.func @transform_0(%arg0: i32) -> (i32, i32) {
    %c0_i32 = arith.constant 0 : i32
    %c0_i32_0 = arith.constant 0 : i32
    return %c0_i32, %arg0 : i32, i32
  }
  func.func @transform_1(%arg0: i32) -> (i32, i32) {
    %c0_i32 = arith.constant 0 : i32
    %c0_i32_0 = arith.constant 0 : i32
    %c0_i32_1 = arith.constant 0 : i32
    return %c0_i32, %c0_i32_0 : i32, i32
  }
  func.func @transform_2(%arg0: i32) -> (i32, i32) {
    %c0_i32 = arith.constant 0 : i32
    %c0_i32_0 = arith.constant 0 : i32
    %c0_i32_1 = arith.constant 0 : i32
    return %c0_i32, %c0_i32_0 : i32, i32
  }
  func.func @transform_3(%arg0: i32) -> (i32, i32) {
    %c0_i32 = arith.constant 0 : i32
    %c0_i32_0 = arith.constant 0 : i32
    %c0_i32_1 = arith.constant 0 : i32
    return %c0_i32, %c0_i32_0 : i32, i32
  }
  func.func @transform_4(%arg0: i32) -> (i32, i32) {
    %c0_i32 = arith.constant 0 : i32
    %c0_i32_0 = arith.constant 0 : i32
    %c0_i32_1 = arith.constant 0 : i32
    return %c0_i32, %c0_i32_0 : i32, i32
  }
  func.func @transform_5(%arg0: i32) -> (i32, i32) {
    %c0_i32 = arith.constant 0 : i32
    %c0_i32_0 = arith.constant 0 : i32
    %c0_i32_1 = arith.constant 0 : i32
    return %c0_i32, %c0_i32_0 : i32, i32
  }
  func.func @transform_6(%arg0: i32) -> (i32, i32) {
    %c0_i32 = arith.constant 0 : i32
    %c0_i32_0 = arith.constant 0 : i32
    %c0_i32_1 = arith.constant 0 : i32
    return %c0_i32, %c0_i32_0 : i32, i32
  }
  func.func @transform_7(%arg0: i32) -> (i32, i32) {
    %c0_i32 = arith.constant 0 : i32
    %c0_i32_0 = arith.constant 0 : i32
    %c0_i32_1 = arith.constant 0 : i32
    return %c0_i32, %c0_i32_0 : i32, i32
  }
  func.func @transform_8(%arg0: i32) -> (i32, i32) {
    %c0_i32 = arith.constant 0 : i32
    %c0_i32_0 = arith.constant 0 : i32
    %c0_i32_1 = arith.constant 0 : i32
    return %c0_i32, %c0_i32_0 : i32, i32
  }
  func.func @transform_9(%arg0: i32) -> (i32, i32) {
    %c0_i32 = arith.constant 0 : i32
    %c0_i32_0 = arith.constant 0 : i32
    %c0_i32_1 = arith.constant 0 : i32
    return %c0_i32, %c0_i32_0 : i32, i32
  }
  func.func @transform_10(%arg0: i32) -> (i32, i32) {
    %c0_i32 = arith.constant 0 : i32
    %c0_i32_0 = arith.constant 0 : i32
    return %c0_i32, %arg0 : i32, i32
  }
}

</mosaic_0001>

<bundles_post_ra>
// kernel: convup_pallas.1
= control target key start
LH: loop header
LB: loop body
LE: loop exit
PB: predicated region body
PF: predicated region fallthrough
CT: control target
= control target key end

     0   :  { %s1890_s13 = smov 0   ;;  %s2197_s0 = inlined_call_operand.vmem [shape: f32[8,512], index: 0, kind: input, shape index: {}]   ;;  %s2198_s1 = inlined_call_operand.vmem [shape: f32[8,256], index: 1, kind: input, shape index: {}]   ;;  %s2199_s2 = inlined_call_operand.vmem [shape: f32[88,1], index: 2, kind: input, shape index: {}]   ;;  %s2200_s3 = inlined_call_operand.vmem [shape: bf16[24,8], index: 3, kind: input, shape index: {}]   ;;  %s2201_s4 = inlined_call_operand.vmem [shape: bf16[8,8], index: 4, kind: input, shape index: {}]   ;;  %s2202_s5 = inlined_call_operand.vmem [shape: bf16[16,8], index: 5, kind: input, shape index: {}]   ;;  %s2203_s6 = inlined_call_operand.vmem [shape: bf16[16,8], index: 6, kind: input, shape index: {}]   ;;  %s2204_s7 = inlined_call_operand.vmem [shape: bf16[16,16], index: 7, kind: input, shape index: {}]   ;;  %s2205_s8 = inlined_call_operand.vmem [shape: bf16[16,128], index: 8, kind: input, shape index: {}]   ;;  %s2206_s9 = inlined_call_operand.vmem [shape: bf16[8,16], index: 9, kind: input, shape index: {}]   ;;  %s2207_s10 = inlined_call_operand.vmem [shape: f32[8,512], index: 10, kind: output, shape index: {}]  }
   0x1 LB: > { %s1666_s14 = sadd.s32 4294967295, %s1824_s13   ;;  %p1670_p0 = scmp.ge.s32.totalorder %s1824_s13, 1  ;;  %s1824_s13 = sphi %s1890_s13, %s20_s13  }
   0x2   : > { %p313_p1 = scmp.lt.s32.totalorder %s1824_s13, 3 }
   0x4   : > { %p314_p2 = pnand %p1670_p0, %p313_p1 }
   0x5   : > { %s1671_s25 = sshll.u32 (!%p314_p2), %s1666_s14, 1  ;;  %s1827_s30 = smov (!%p314_p2), 111  }
   0x6   : > { %317 = sbr.rel (%p314_p2) target bundleno = 2081 (0x821), region = 60  ;;  %p352_p3 = scmp.lt.s32.totalorder (!%p314_p2), %s1671_s25, 3 }
   0x7   : > { %s1828_s11 = smov (!%p314_p2), 112   ;;  %s1829_s12 = smov (!%p314_p2), 113  }
   0x8   : > { %s1830_s14 = smov (!%p314_p2), 127   ;;  %s1831_s15 = smov (!%p314_p2), 1  }
   0x9   : > { %s1832_s16 = smov (!%p314_p2), 15   ;;  %s1833_s17 = smov (!%p314_p2), 16  }
   0xa   : > { %s1834_s18 = smov (!%p314_p2), 17  }
   0xb   : > { %v366_v0 = vld [vmem:[%s2199_s2] sm:$0xff]  ;;  %v1826_v1 = vmov 0   ;;  %v367_v2 = vld [vmem:[%s2199_s2 + $0x8] sm:$0xff]  ;;  %v368_v4 = vld [vmem:[%s2199_s2 + $0x10] sm:$0xff]  ;;  %s2209_s25 = smov (!%p352_p3, %s1671_s25), 3  ;;  %vm465_vm0 = vcmask 1043456  }
   0xc   : > { %1784 = vset.pattern.permute.xlu0 %v1826_v1  ;;  %504 = vmatprep.mubr.bf16.mxu0 %v1826_v1  ;;  %v370_v3 = vld [vmem:[%s2199_s2 + $0x20] sm:$0xff]  ;;  %v369_v5 = vld [vmem:[%s2199_s2 + $0x18] sm:$0xff]  ;;  %s1672_s26 = sshll.u32 %s2209_s25, 3  ;;  %vm458_vm1 = vcmask 64512   ;;  %v1787_v56 = vld [vmem:[%s2200_s3 + $0x8] ss:$0 sps:$4 sm:$0xff]  }
   0xd   : > { %418 = vperm.xlu0 %1784, %v366_v0   ;;  %1785 = vset.pattern.permute.xlu1 %v1826_v1  ;;  %s1925_s29 = scalar_lea.vmem %s2197_s0, %s1672_s26  ;;  %v1786_v55 = vld [vmem:[%s2200_s3] sm:$0xff]   ;;  %vm1481_vm12 = vcmask 130048  }
   0xe   : > { %749 = vmatprep.mubr.bf16.mxu1 %v1826_v1  ;;  %442 = vperm.xlu1 %1785, %v369_v5   ;;  %v1928_v6 = vld [vmem:[%s1925_s29] sm:$0xff]  ;;  %v1931_v7 = vld [vmem:[%s1925_s29 + $0x8] sm:$0xff] }
   0xf   : > { %v377_v8 = vrot.slane %v1928_v6, 4  ;;  %v383_v9 = vrot.slane %v1931_v7, 4 }
  0x11   : > { %425 = vperm.xlu0 %1784, %v367_v2   ;;  %v378_v10 = vadd.f32 %v377_v8, %v1928_v6  ;;  %v384_v11 = vadd.f32 %v383_v9, %v1931_v7 }
  0x13   : > { %v379_v12 = vrot.slane %v378_v10, 2  ;;  %v385_v13 = vrot.slane %v384_v11, 2 }
  0x15   : > { %447 = vperm.xlu0 %1784, %v370_v3   ;;  %v380_v14 = vadd.f32 %v379_v12, %v378_v10  ;;  %v386_v15 = vadd.f32 %v385_v13, %v384_v11 }
  0x17   : > { %v381_v16 = vrot.slane %v380_v14, 1  ;;  %v387_v17 = vrot.slane %v386_v15, 1 }
  0x19   : > { %437 = vperm.xlu0 %1784, %v368_v4   ;;  %v382_v18 = vadd.f32 %v381_v16, %v380_v14  ;;  %v388_v19 = vadd.f32 %v387_v17, %v386_v15 }
  0x1b   : > { %v390_v20 = vmul.f32 0.125, %v382_v18  ;;  %v391_v21 = vmul.f32 0.125, %v388_v19 }
  0x1d   : > { %v392_v22 = vsub.f32 %v1928_v6, %v390_v20  ;;  %v393_v23 = vsub.f32 %v1931_v7, %v391_v21 }
  0x1f   : > { %v394_v24 = vmul.f32 %v392_v22, %v392_v22  ;;  %v395_v25 = vmul.f32 %v393_v23, %v393_v23 }
  0x21   : > { %v396_v26 = vrot.slane %v394_v24, 4  ;;  %v402_v27 = vrot.slane %v395_v25, 4 }
  0x23   : > { %v397_v28 = vadd.f32 %v396_v26, %v394_v24  ;;  %v403_v29 = vadd.f32 %v402_v27, %v395_v25 }
  0x25   : > { %v398_v30 = vrot.slane %v397_v28, 2  ;;  %v404_v31 = vrot.slane %v403_v29, 2 }
  0x27   : > { %v399_v32 = vadd.f32 %v398_v30, %v397_v28  ;;  %v405_v33 = vadd.f32 %v404_v31, %v403_v29 }
  0x29   : > { %v400_v34 = vrot.slane %v399_v32, 1  ;;  %v406_v35 = vrot.slane %v405_v33, 1 }
  0x2b   : > { %v401_v36 = vadd.f32 %v400_v34, %v399_v32  ;;  %v407_v37 = vadd.f32 %v406_v35, %v405_v33 }
  0x2d   : > { %v408_v38 = vmul.f32 0.125, %v401_v36  ;;  %v409_v39 = vmul.f32 0.125, %v407_v37 }
  0x2f   : > { %v410_v40 = vadd.f32 1e-05, %v408_v38  ;;  %v411_v41 = vadd.f32 1e-05, %v409_v39 }
  0x31   : > { %1792 = vrsqrt.f32 %v410_v40 }
  0x32   : > { %1794 = vrsqrt.f32 %v411_v41 }
  0x3e   : > { %v1793_v42 = vpop.eup %1792 }
  0x3f   : > { %v1795_v43 = vpop.eup %1794  ;;  %v414_v44 = vmul.f32 %v1793_v42, %v392_v22 }
  0x40   : > { %v415_v45 = vmul.f32 %v1795_v43, %v393_v23 }
  0x88   : > { %v419_v46 = vpop.permute.xlu0 %418 }
  0x89   : > { %v421_v47 = vmul.f32 %v419_v46, %v414_v44  ;;  %v422_v48 = vmul.f32 %v419_v46, %v415_v45  ;;  %v443_v62 = vpop.permute.xlu1 %442 }
  0x8c   : > { %v426_v49 = vpop.permute.xlu0 %425 }
  0x8d   : > { %v428_v50 = vadd.f32 %v426_v49, %v421_v47  ;;  %v429_v51 = vadd.f32 %v426_v49, %v422_v48 }
  0x8f   : > { %v433_v52 = vpack.c.bf16 %v428_v50, %v428_v50  ;;  %v434_v53 = vpack.c.bf16 %v429_v51, %v429_v51 }
  0x90   : > { %v448_v57 = vpop.permute.xlu0 %447 }
  0x91   : > { %1677 = vmatprep.subr.msk.bf16.mxu0 %vm465_vm0, %v434_v53  ;;  %v467_v54 = vsel %vm465_vm0, %v433_v52, 0 }
  0x92   : > { %487 = vmatpush1.bf16.msra.mxu0 %v467_v54 }
  0x94   : > { %v438_v58 = vpop.permute.xlu0 %437 }
  0x95   : > { %1678 = vmatmul.mubr.msk.bf16.vlgmr.msra.gmra.mxu0 %vm458_vm1, %v1786_v55 }
  0x96   : > { %514 = vmatprep.mubr.bf16.mxu0 %v1826_v1 }
  0x9d   : > { %1679 = vmatmul.mubr.msk.bf16.gmra.mxu0 %vm458_vm1, %v1787_v56 }
 0x155   : > { %v506_v59 = vpop.f32.mrf.mxu0 }
 0x156   : > { %v507_v60 = vadd.f32 %v506_v59, %v438_v58 }
 0x157   : > { %v508_v61 = vpop.f32.mrf.mxu0 }
 0x158   : > { %v523_v63 = vrot.slane %v507_v60, 4  ;;  %v509_v0 = vadd.f32 %v508_v61, %v438_v58 }
 0x159   : > { %v510_v2 = vpop.f32.mrf.mxu0 }
 0x15a   : > { %v524_v3 = vadd.f32 %v523_v63, %v507_v60  ;;  %v529_v4 = vrot.slane %v509_v0, 4  ;;  %v511_v5 = vadd.f32 %v510_v2, %v443_v62 }
 0x15b   : > { %v512_v8 = vpop.f32.mrf.mxu0 }
 0x15c   : > { %v525_v9 = vrot.slane %v524_v3, 2  ;;  %v530_v10 = vadd.f32 %v529_v4, %v509_v0  ;;  %v539_v11 = vrot.slane %v511_v5, 4  ;;  %v513_v12 = vadd.f32 %v512_v8, %v443_v62 }
 0x15d   : > { %v516_v13 = vpop.f32.mrf.mxu0 }
 0x15e   : > { %v526_v14 = vadd.f32 %v525_v9, %v524_v3  ;;  %v531_v15 = vrot.slane %v530_v10, 2  ;;  %v540_v16 = vadd.f32 %v539_v11, %v511_v5  ;;  %v545_v17 = vrot.slane %v513_v12, 4 }
 0x15f   : > { %v1950_v18 = vadd.f32 %v516_v13, %v448_v57  ;;  %v518_v19 = vpop.f32.mrf.mxu0 }
 0x160   : > { %v527_v20 = vrot.slane %v526_v14, 1  ;;  %v532_v21 = vadd.f32 %v531_v15, %v530_v10  ;;  %v541_v22 = vrot.slane %v540_v16, 2  ;;  %v546_v23 = vadd.f32 %v545_v17, %v513_v12 }
 0x161   : > { %v1952_v24 = vadd.f32 %v518_v19, %v448_v57  ;;  %v520_v25 = vpop.f32.mrf.mxu0  ;;  %v647_v30 = vpack.c.bf16 %v1950_v18, %v1950_v18 }
 0x162   : > { %v528_v26 = vadd.f32 %v527_v20, %v526_v14  ;;  %v533_v27 = vrot.slane %v532_v21, 1  ;;  %v542_v28 = vadd.f32 %v541_v22, %v540_v16  ;;  %v547_v29 = vrot.slane %v546_v23, 2 }
 0x163   : > { %v648_v31 = vpack.c.bf16 %v1952_v24, %v1952_v24  ;;  %v521_v32 = vpop.f32.mrf.mxu0 }
 0x164   : > { %v535_v33 = vmul.f32 0.125, %v528_v26  ;;  %v534_v34 = vadd.f32 %v533_v27, %v532_v21  ;;  %v543_v35 = vrot.slane %v542_v28, 1  ;;  %v548_v36 = vadd.f32 %v547_v29, %v546_v23 }
 0x165   : > { %663 = vmatprep.subr.bf16.mxu0 %v648_v31 }
 0x166   : > { %v537_v37 = vsub.f32 %v507_v60, %v535_v33  ;;  %v536_v38 = vmul.f32 0.125, %v534_v34  ;;  %v544_v39 = vadd.f32 %v543_v35, %v542_v28  ;;  %v549_v40 = vrot.slane %v548_v36, 1  ;;  %664 = vmatpush1.bf16.xpose.msra.mxu0 %v647_v30 }
 0x168   : > { %v555_v41 = vmul.f32 %v537_v37, %v537_v37  ;;  %v538_v42 = vsub.f32 %v509_v0, %v536_v38  ;;  %v551_v43 = vmul.f32 0.125, %v544_v39  ;;  %v550_v44 = vadd.f32 %v549_v40, %v548_v36 }
 0x16a   : > { %v559_v45 = vrot.slane %v555_v41, 4  ;;  %v556_v46 = vmul.f32 %v538_v42, %v538_v42  ;;  %v553_v47 = vsub.f32 %v511_v5, %v551_v43  ;;  %v552_v48 = vmul.f32 0.125, %v550_v44 }
 0x16c   : > { %v560_v49 = vadd.f32 %v559_v45, %v555_v41  ;;  %v565_v50 = vrot.slane %v556_v46, 4  ;;  %v557_v51 = vmul.f32 %v553_v47, %v553_v47  ;;  %v554_v52 = vsub.f32 %v513_v12, %v552_v48  ;;  %v371_v45 = vld [vmem:[%s2199_s2 + $0x28] sm:$0xff] }
 0x16e   : > { %v561_v53 = vrot.slane %v560_v49, 2  ;;  %v566_v54 = vadd.f32 %v565_v50, %v556_v46  ;;  %v577_v55 = vrot.slane %v557_v51, 4  ;;  %v558_v56 = vmul.f32 %v554_v52, %v554_v52 }
 0x170   : > { %v562_v57 = vadd.f32 %v561_v53, %v560_v49  ;;  %v567_v58 = vrot.slane %v566_v54, 2  ;;  %v578_v59 = vadd.f32 %v577_v55, %v557_v51  ;;  %v583_v60 = vrot.slane %v558_v56, 4 }
 0x172   : > { %v563_v61 = vrot.slane %v562_v57, 1  ;;  %v568_v62 = vadd.f32 %v567_v58, %v566_v54  ;;  %v579_v63 = vrot.slane %v578_v59, 2  ;;  %v584_v0 = vadd.f32 %v583_v60, %v558_v56 }
 0x174   : > { %v564_v2 = vadd.f32 %v563_v61, %v562_v57  ;;  %v569_v3 = vrot.slane %v568_v62, 1  ;;  %v580_v4 = vadd.f32 %v579_v63, %v578_v59  ;;  %v585_v5 = vrot.slane %v584_v0, 2 }
 0x176   : > { %v571_v8 = vadd.f32 1e-07, %v564_v2  ;;  %v570_v9 = vadd.f32 %v569_v3, %v568_v62  ;;  %v581_v10 = vrot.slane %v580_v4, 1  ;;  %v586_v11 = vadd.f32 %v585_v5, %v584_v0 }
 0x178   : > { %1796 = vrcp.f32 %v571_v8  ;;  %v572_v12 = vadd.f32 1e-07, %v570_v9  ;;  %v582_v13 = vadd.f32 %v581_v10, %v580_v4  ;;  %v587_v14 = vrot.slane %v586_v11, 1 }
 0x17a   : > { %1798 = vrcp.f32 %v572_v12  ;;  %v589_v15 = vadd.f32 1e-07, %v582_v13  ;;  %v588_v16 = vadd.f32 %v587_v14, %v586_v11 }
 0x17c   : > { %1800 = vrcp.f32 %v589_v15  ;;  %v590_v17 = vadd.f32 1e-07, %v588_v16 }
 0x17e   : > { %1802 = vrcp.f32 %v590_v17 }
 0x185   : > { %v1797_v19 = vpop.eup %1796 }
 0x186   : > { %v574_v20 = vmul.f32 %v1797_v19, %v555_v41 }
 0x187   : > { %v1799_v21 = vpop.eup %1798 }
 0x188   : > { %v576_v22 = vmul.f32 %v1799_v21, %v556_v46  ;;  %v595_v23 = vmul.f32 %v574_v20, %v574_v20 }
 0x189   : > { %v1801_v25 = vpop.eup %1800 }
 0x18a   : > { %v1958_v26 = vmul.f32 %v1801_v25, %v557_v51  ;;  %v596_v27 = vmul.f32 %v576_v22, %v576_v22  ;;  %v597_v28 = vrot.slane %v595_v23, 4 }
 0x18b   : > { %v1803_v29 = vpop.eup %1802 }
 0x18c   : > { %v594_v30 = vmul.f32 %v1803_v29, %v558_v56  ;;  %v603_v31 = vrot.slane %v596_v27, 4  ;;  %v598_v32 = vadd.f32 %v597_v28, %v595_v23  ;;  %v629_v33 = vmul.f32 %v1958_v26, %v1958_v26  ;;  %v373_v23 = vld [vmem:[%s2199_s2 + $0x38] sm:$0xff] }
 0x18e   : > { %v630_v34 = vmul.f32 %v594_v30, %v594_v30  ;;  %v604_v35 = vadd.f32 %v603_v31, %v596_v27  ;;  %v599_v36 = vrot.slane %v598_v32, 2 }
 0x190   : > { %v631_v37 = vadd.f32 %v630_v34, %v629_v33  ;;  %v605_v38 = vrot.slane %v604_v35, 2  ;;  %v600_v39 = vadd.f32 %v599_v36, %v598_v32 }
 0x192   : > { %632 = vadd.xlane.f32.xlu1 %v631_v37  ;;  %v606_v40 = vadd.f32 %v605_v38, %v604_v35  ;;  %v601_v41 = vrot.slane %v600_v39, 1  ;;  %v764_v37 = vld [vmem:[%s2201_s4] sm:$0xf] }
 0x194   : > { %v607_v42 = vrot.slane %v606_v40, 1  ;;  %v602_v43 = vadd.f32 %v601_v41, %v600_v39  ;;  %v1788_v39 = vld [vmem:[%s2203_s6] sm:$0xff]  }
 0x196   : > { %v608_v44 = vadd.f32 %v607_v42, %v606_v40  ;;  %1804 = vrsqrt.f32 %v602_v43  ;;  %vm611_vm2 = vcmp.eq.f32.partialorder %v602_v43, inf  ;;  %v614_v49 = vand.u32 2147483648, %v602_v43 }
 0x197   : > { %vm613_vm3 = vcmp.eq.f32.partialorder %v602_v43, 0.0 }
 0x198   : > { %1806 = vrsqrt.f32 %v608_v44  ;;  %vm618_vm4 = vcmp.eq.f32.partialorder %v608_v44, inf  ;;  %v621_v52 = vand.u32 2147483648, %v608_v44  ;;  %vm620_vm5 = vcmp.eq.f32.partialorder %v608_v44, 0.0 }
 0x1a3   : > { %v1805_v46 = vpop.eup %1804  ;;  %771 = vperm.xlu1 %1785, %v371_v45  }
 0x1a4   : > { %v610_v47 = vmul.f32 %v1805_v46, %v602_v43 }
 0x1a5   : > { %v1807_v48 = vpop.eup %1806 }
 0x1a6   : > { %v617_v50 = vmul.f32 %v1807_v48, %v608_v44  ;;  %v612_v51 = vsel %vm611_vm2, %v602_v43, %v610_v47  ;;  %v1789_v48 = vld [vmem:[%s2202_s5] sm:$0xff]  }
 0x1a7   : > { %v615_v53 = vsel %vm613_vm3, %v614_v49, %v612_v51 }
 0x1a8   : > { %v619_v54 = vsel %vm618_vm4, %v608_v44, %v617_v50  ;;  %v623_v55 = vmax.f32 %v615_v53, 1e-12 }
 0x1a9   : > { %v622_v56 = vsel %vm620_vm5, %v621_v52, %v619_v54 }
 0x1aa   : > { %v624_v57 = vmax.f32 %v622_v56, 1e-12  ;;  %1808 = vrcp.f32 %v623_v55 }
 0x1ac   : > { %1810 = vrcp.f32 %v624_v57 }
 0x1b7   : > { %v1809_v58 = vpop.eup %1808 }
 0x1b8   : > { %v626_v59 = vmul.f32 %v1809_v58, %v574_v20 }
 0x1b9   : > { %v1811_v60 = vpop.eup %1810 }
 0x1ba   : > { %v628_v61 = vmul.f32 %v1811_v60, %v576_v22  ;;  %v690_v62 = vpack.c.bf16 %v626_v59, %v626_v59  ;;  %v372_v22 = vld [vmem:[%s2199_s2 + $0x30] sm:$0xff] }
 0x1bc   : > { %v691_v63 = vpack.c.bf16 %v628_v61, %v628_v61  ;;  %v712_v0 = vsel %vm465_vm0, %v690_v62, 0 }
 0x1be   : > { %1680 = vmatprep.subr.msk.bf16.mxu1 %vm465_vm0, %v691_v63 }
 0x1bf   : > { %732 = vmatpush1.bf16.msra.mxu1 %v712_v0 }
 0x21b   : > { %v633_v2 = vpop.xlane.xlu1 %632 }
 0x21c   : > { %1812 = vrsqrt.f32 %v633_v2  ;;  %vm636_vm6 = vcmp.eq.f32.partialorder %v633_v2, inf  ;;  %v639_v5 = vand.u32 2147483648, %v633_v2  ;;  %vm638_vm7 = vcmp.eq.f32.partialorder %v633_v2, 0.0 }
 0x21f   : > { %v772_v40 = vpop.permute.xlu1 %771 }
 0x229   : > { %v1813_v3 = vpop.eup %1812 }
 0x22a   : > { %v635_v4 = vmul.f32 %v1813_v3, %v633_v2 }
 0x22c   : > { %v637_v8 = vsel %vm636_vm6, %v633_v2, %v635_v4 }
 0x22d   : > { %v640_v9 = vsel %vm638_vm7, %v639_v5, %v637_v8 }
 0x22e   : > { %v641_v10 = vmax.f32 %v640_v9, 1e-12 }
 0x230   : > { %1814 = vrcp.f32 %v641_v10 }
 0x23d   : > { %v1815_v11 = vpop.eup %1814 }
 0x23e   : > { %v644_v12 = vmul.f32 %v1815_v11, %v594_v30  ;;  %v643_v13 = vmul.f32 %v1815_v11, %v1958_v26 }
 0x240   : > { %v646_v14 = vpack.c.bf16 %v644_v12, %v644_v12  ;;  %v645_v15 = vpack.c.bf16 %v643_v13, %v643_v13 }
 0x242   : > { %681 = vmatprep.mubr.bf16.mxu0 %v646_v14 }
 0x243   : > { %682 = vmatmul.mubr.bf16.vlgmr.msra.gmra.mxu0 %v645_v15 }
 0x244   : > { %815 = vmatprep.mubr.bf16.mxu0 %v1826_v1 }
 0x303   : > { %v683_v16 = vpop.f32.mrf.mxu0 }
 0x304   : > { %v689_v17 = vpack.c.bf16 %v683_v16, %v683_v16  ;;  %v1790_v16 = vld [vmem:[%s2204_s7] sm:$0xff]  }
 0x305   : > { %v685_v19 = vpop.f32.mrf.mxu0 }
 0x306   : > { %692 = vxpose.xlu0.c.b16.start.end [1/1] (short) (narrow) %v689_v17, 16  ;;  %v374_v17 = vld [vmem:[%s2199_s2 + $0x40] sm:$0xff]  ;;  %v376_v19 = vld [vmem:[%s2199_s2 + $0x50] sm:$0xff] }
 0x307   : > { %v686_v20 = vpop.f32.mrf.mxu0 }
 0x308   : > { %v375_v20 = vld [vmem:[%s2199_s2 + $0x48] sm:$0xff] }
 0x309   : > { %v687_v21 = vpop.f32.mrf.mxu0 }
 0x30f   : > { %948 = vperm.xlu0 %1784, %v372_v22  }
 0x313   : > { %953 = vperm.xlu0 %1784, %v373_v23  }
 0x368   : > { %v700_v25 = vpop.trf.xlu0 }
 0x369   : > { %1681 = vmatmul.mubr.msk.bf16.vlgmr.msra.gmra.mxu1 %vm458_vm1, %v700_v25 }
 0x36a   : > { %878 = vmatprep.mubr.bf16.mxu1 %v1826_v1 }
 0x38a   : > { %v949_v51 = vpop.permute.xlu0 %948 }
 0x38e   : > { %v954_v61 = vpop.permute.xlu0 %953 }
 0x429   : > { %v751_v26 = vpop.f32.mrf.mxu1 }
 0x42a   : > { %v758_v27 = vmul.f32 0.0625, %v751_v26 }
 0x42b   : > { %v753_v28 = vpop.f32.mrf.mxu1 }
 0x42c   : > { %v760_v29 = vadd.f32 %v758_v27, %v1950_v18  ;;  %v759_v30 = vmul.f32 0.0625, %v753_v28  ;;  %v831_v18 = vpack.c.bf16 %v1931_v7, %v1931_v7 }
 0x42d   : > { %v755_v31 = vpop.f32.mrf.mxu1 }
 0x42e   : > { %v767_v32 = vpack.c.bf16 %v760_v29, %v760_v29  ;;  %v761_v33 = vadd.f32 %v759_v30, %v1952_v24  ;;  %v830_v24 = vpack.c.bf16 %v1928_v6, %v1928_v6  ;;  %1685 = vmatprep.subr.msk.bf16.mxu1 %vm465_vm0, %v831_v18 }
 0x42f   : > { %v756_v34 = vpop.f32.mrf.mxu1 }
 0x430   : > { %v768_v35 = vpack.c.bf16 %v761_v33, %v761_v33  ;;  %v778_v36 = vsel %vm465_vm0, %v767_v32, 0  ;;  %v841_v38 = vsel %vm465_vm0, %v830_v24, 0  ;;  %v984_v32 = vlaneseq }
 0x431   : > { %861 = vmatpush1.bf16.msra.mxu1 %v841_v38 }
 0x432   : > { %1682 = vmatprep.subr.msk.bf16.mxu0 %vm465_vm0, %v768_v35  ;;  %v994_v35 = vshrl.u32 %v984_v32, 7  ;;  %v2046_v18 = vand.u32 127, %v984_v32 }
 0x433   : > { %798 = vmatpush1.bf16.msra.mxu0 %v778_v36 }
 0x434   : > { %1686 = vmatmul.mubr.msk.bf16.vlgmr.msra.gmra.mxu1 %vm458_vm1, %v1788_v39  ;;  %v2048_v24 = vsub.s32 0, %v994_v35  ;;  %v2050_v38 = vsub.s32 1, %v994_v35  ;;  %v1710_v39 = vld [vmem:[%s2198_s1 + $0x7] ss:$8 sm:$0x3]  ;;  %vm1293_vm13 = vcmp.lt.s32.totalorder %v2046_v18, 111 }
 0x435   : > { %1465 = vmatprep.mubr.bf16.mxu1 %v1826_v1  ;;  %vm1249_vm14 = vcmp.lt.s32.totalorder %v2046_v18, 112  ;;  %vm1205_vm15 = vcmp.lt.s32.totalorder %v2046_v18, 113  ;;  %vm1073_vm2 = vcmp.lt.s32.totalorder %v2046_v18, 15  ;;  %vm1029_vm3 = vcmp.lt.s32.totalorder %v2046_v18, 16 }
 0x436   : > { %1683 = vmatmul.mubr.msk.bf16.vlgmr.msra.gmra.mxu0 %vm458_vm1, %v764_v37  ;;  %vm986_vm4 = vcmp.lt.s32.totalorder %v2046_v18, 17 }
 0x437   : > { %935 = vmatprep.mubr.bf16.mxu0 %v1826_v1 }
 0x4f4   : > { %v880_v49 = vpop.f32.mrf.mxu1 }
 0x4f6   : > { %v817_v41 = vpop.f32.mrf.mxu0  ;;  %v882_v50 = vpop.f32.mrf.mxu1 }
 0x4f7   : > { %v818_v42 = vadd.f32 %v817_v41, %v772_v40 }
 0x4f8   : > { %v819_v7 = vpop.f32.mrf.mxu0  ;;  %v884_v55 = vpop.f32.mrf.mxu1 }
 0x4f9   : > { %v826_v43 = vpack.c.bf16 %v818_v42, %v818_v42  ;;  %v820_v44 = vadd.f32 %v819_v7, %v772_v40  ;;  %v1304_v42 = vrot.slane %v1710_v39, %v2048_v24  ;;  %v1308_v7 = vrot.slane %v1710_v39, %v2050_v38 }
 0x4fa   : > { %v821_v6 = vpop.f32.mrf.mxu0  ;;  %v886_v0 = vpop.f32.mrf.mxu1 }
 0x4fb   : > { %v827_v45 = vpack.c.bf16 %v820_v44, %v820_v44  ;;  %v898_v47 = vsel %vm465_vm0, %v826_v43, 0  ;;  %v1707_v43 = vld [vmem:[%s2198_s1 + $0x6] ss:$8 sm:$0x3] }
 0x4fc   : > { %v822_v46 = vpop.f32.mrf.mxu0 }
 0x4fd   : > { %1688 = vmatprep.subr.msk.bf16.mxu0 %vm465_vm0, %v827_v45  ;;  %vm1161_vm0 = vcmp.lt.s32.totalorder %v2046_v18, 127 }
 0x4fe   : > { %918 = vmatpush1.bf16.msra.mxu0 %v898_v47  ;;  %v1260_v47 = vrot.slane %v1707_v43, %v2048_v24 }
 0x501   : > { %1689 = vmatmul.mubr.msk.bf16.vlgmr.msra.gmra.mxu0 %vm458_vm1, %v1789_v48  ;;  %v1264_v48 = vrot.slane %v1707_v43, %v2050_v38  ;;  %vm1117_vm1 = vcmp.lt.s32.totalorder %v2046_v18, 1 }
 0x502   : > { %1517 = vmatprep.mubr.bf16.mxu0 %v1826_v1 }
 0x5c1   : > { %v937_v52 = vpop.f32.mrf.mxu0 }
 0x5c2   : > { %v938_v53 = vadd.f32 %v937_v52, %v880_v49 }
 0x5c3   : > { %v939_v54 = vpop.f32.mrf.mxu0 }
 0x5c4   : > { %v956_v56 = vadd.f32 %v949_v51, %v938_v53  ;;  %v940_v57 = vadd.f32 %v939_v54, %v882_v50 }
 0x5c5   : > { %v941_v58 = vpop.f32.mrf.mxu0 }
 0x5c6   : > { %vm960_vm8 = vcmp.ge.f32.partialorder %v956_v56, 0.0  ;;  %v964_v59 = vmul.f32 0.2, %v956_v56  ;;  %v942_v60 = vadd.f32 %v941_v58, %v884_v55  ;;  %v957_v62 = vadd.f32 %v949_v51, %v940_v57  ;;  %v1704_v55 = vld [vmem:[%s2198_s1 + $0x5] ss:$8 sm:$0x3] }
 0x5c7   : > { %v943_v63 = vpop.f32.mrf.mxu0 }
 0x5c8   : > { %v968_v2 = vsel %vm960_vm8, %v956_v56, %v964_v59  ;;  %v958_v3 = vadd.f32 %v954_v61, %v942_v60  ;;  %v944_v4 = vadd.f32 %v943_v63, %v886_v0  ;;  %v965_v8 = vmul.f32 0.2, %v957_v62 }
 0x5c9   : > { %1285 = vrot.lane.b32.xlu1 %v968_v2, %s1827_s30  ;;  %vm961_vm10 = vcmp.ge.f32.partialorder %v957_v62, 0.0  ;;  %v1220_v63 = vrot.slane %v1704_v55, %v2050_v38 }
 0x5ca   : > { %vm962_vm9 = vcmp.ge.f32.partialorder %v958_v3, 0.0  ;;  %v966_v5 = vmul.f32 0.2, %v958_v3  ;;  %v959_v9 = vadd.f32 %v954_v61, %v944_v4  ;;  %v969_v12 = vsel %vm961_vm10, %v957_v62, %v965_v8 }
 0x5cb   : > { %v1216_v62 = vrot.slane %v1704_v55, %v2048_v24 }
 0x5cc   : > { %v970_v10 = vsel %vm962_vm9, %v958_v3, %v966_v5  ;;  %vm963_vm11 = vcmp.ge.f32.partialorder %v959_v9, 0.0  ;;  %v967_v11 = vmul.f32 0.2, %v959_v9 }
 0x5cd   : > { %1241 = vrot.lane.b32.xlu1 %v968_v2, %s1828_s11  ;;  %1287 = vrot.lane.b32.xlu0 %v970_v10, %s1827_s30  ;;  %v974_v15 = vpack.c.bf16 %v970_v10, %v968_v2 }
 0x5ce   : > { %v971_v13 = vsel %vm963_vm11, %v959_v9, %v967_v11  ;;  %v1701_v9 = vld [vmem:[%s2198_s1 + $0x4] ss:$8 sm:$0x3] }
 0x5cf   : > { %v975_v14 = vpack.c.bf16 %v971_v13, %v969_v12 }
 0x5d1   : > { %1197 = vrot.lane.b32.xlu1 %v968_v2, %s1829_s12  ;;  %1243 = vrot.lane.b32.xlu0 %v970_v10, %s1828_s11 }
 0x5d2   : > { %1499 = vmatprep.subr.bf16.mxu0 %v975_v14 }
 0x5d3   : > { %1500 = vmatpush1.bf16.msra.mxu0 %v974_v15 }
 0x5d5   : > { %1153 = vrot.lane.b32.xlu1 %v968_v2, %s1830_s14  ;;  %1199 = vrot.lane.b32.xlu0 %v970_v10, %s1829_s12 }
 0x5d6   : > { %1731 = vmatmul.mubr.msk.bf16.vlgmr.msra.gmra.mxu0 %vm1481_vm12, %v1790_v16  ;;  %v1172_v16 = vrot.slane %v1701_v9, %v2048_v24 }
 0x5d7   : > { %1597 = vmatprep.mubr.bf16.mxu0 %v1826_v1 }
 0x5d9   : > { %1109 = vrot.lane.b32.xlu1 %v968_v2, %s1831_s15  ;;  %1155 = vrot.lane.b32.xlu0 %v970_v10, %s1830_s14 }
 0x5dd   : > { %1065 = vrot.lane.b32.xlu1 %v968_v2, %s1832_s16  ;;  %1111 = vrot.lane.b32.xlu0 %v970_v10, %s1831_s15 }
 0x5e1   : > { %1021 = vrot.lane.b32.xlu1 %v968_v2, %s1833_s17  ;;  %1067 = vrot.lane.b32.xlu0 %v970_v10, %s1832_s16 }
 0x5e5   : > { %976 = vrot.lane.b32.xlu1 %v968_v2, %s1834_s18  ;;  %1023 = vrot.lane.b32.xlu0 %v970_v10, %s1833_s17 }
 0x5e9   : > { %1289 = vrot.lane.b32.xlu1 %v969_v12, %s1827_s30  ;;  %978 = vrot.lane.b32.xlu0 %v970_v10, %s1834_s18 }
 0x5ed   : > { %1245 = vrot.lane.b32.xlu1 %v969_v12, %s1828_s11  ;;  %1291 = vrot.lane.b32.xlu0 %v971_v13, %s1827_s30 }
 0x5f1   : > { %1201 = vrot.lane.b32.xlu1 %v969_v12, %s1829_s12  ;;  %1247 = vrot.lane.b32.xlu0 %v971_v13, %s1828_s11 }
 0x5f5   : > { %1157 = vrot.lane.b32.xlu1 %v969_v12, %s1830_s14  ;;  %1203 = vrot.lane.b32.xlu0 %v971_v13, %s1829_s12 }
 0x5f9   : > { %1113 = vrot.lane.b32.xlu1 %v969_v12, %s1831_s15  ;;  %1159 = vrot.lane.b32.xlu0 %v971_v13, %s1830_s14 }
 0x5fd   : > { %1069 = vrot.lane.b32.xlu1 %v969_v12, %s1832_s16  ;;  %1115 = vrot.lane.b32.xlu0 %v971_v13, %s1831_s15 }
 0x601   : > { %1025 = vrot.lane.b32.xlu1 %v969_v12, %s1833_s17  ;;  %1071 = vrot.lane.b32.xlu0 %v971_v13, %s1832_s16 }
 0x605   : > { %980 = vrot.lane.b32.xlu1 %v969_v12, %s1834_s18  ;;  %1027 = vrot.lane.b32.xlu0 %v971_v13, %s1833_s17  ;;  %s361_s17 = scalar_lea.vmem %s2207_s10, %s1672_s26 }
 0x609   : > { %1530 = vperm.xlu1 %1785, %v374_v17   ;;  %982 = vrot.lane.b32.xlu0 %v971_v13, %s1834_s18  ;;  %v1176_v17 = vrot.slane %v1701_v9, %v2050_v38 }
 0x60d   : > { %1559 = vperm.xlu1 %1785, %v376_v19   ;;  %1535 = vperm.xlu0 %1784, %v375_v20  }
 0x63b   : > { %v1286_v21 = vpop.permute.xlu1 %1285 }
 0x63f   : > { %v1242_v1 = vpop.permute.xlu1 %1241  ;;  %v1288_v22 = vpop.permute.xlu0 %1287 }
 0x643   : > { %v1198_v23 = vpop.permute.xlu1 %1197  ;;  %v1244_v25 = vpop.permute.xlu0 %1243 }
 0x647   : > { %v2026_v26 = vpop.permute.xlu1 %1153  ;;  %v2028_v27 = vpop.permute.xlu0 %1199 }
 0x64b   : > { %v2030_v28 = vpop.permute.xlu1 %1109  ;;  %v2032_v29 = vpop.permute.xlu0 %1155 }
 0x64f   : > { %v2034_v30 = vpop.permute.xlu1 %1065  ;;  %v2036_v31 = vpop.permute.xlu0 %1111 }
 0x653   : > { %v2038_v33 = vpop.permute.xlu1 %1021  ;;  %v2040_v34 = vpop.permute.xlu0 %1067 }
 0x657   : > { %v2042_v36 = vpop.permute.xlu1 %976  ;;  %v2044_v37 = vpop.permute.xlu0 %1023 }
 0x65b   : > { %v1290_v40 = vpop.permute.xlu1 %1289  ;;  %v2056_v41 = vpop.permute.xlu0 %978 }
 0x65c   : > { %v1294_v44 = vsel %vm1293_vm13, %v1286_v21, %v1290_v40  ;;  %v1296_v6 = vsel %vm1293_vm13, %v1290_v40, %v1286_v21 }
 0x65d   : > { %v1311_v51 = vmul.f32 %v1304_v42, %v1294_v44  ;;  %v1312_v52 = vmul.f32 %v1308_v7, %v1296_v6 }
 0x65f   : > { %v1246_v45 = vpop.permute.xlu1 %1245  ;;  %v1292_v46 = vpop.permute.xlu0 %1291 }
 0x660   : > { %v1295_v49 = vsel %vm1293_vm13, %v1288_v22, %v1292_v46  ;;  %v1297_v50 = vsel %vm1293_vm13, %v1292_v46, %v1288_v22  ;;  %v1250_v56 = vsel %vm1249_vm14, %v1242_v1, %v1246_v45  ;;  %v1252_v57 = vsel %vm1249_vm14, %v1246_v45, %v1242_v1 }
 0x661   : > { %v1313_v53 = vmul.f32 %v1304_v42, %v1295_v49  ;;  %v1314_v54 = vmul.f32 %v1308_v7, %v1297_v50  ;;  %v1267_v3 = vmul.f32 %v1260_v47, %v1250_v56  ;;  %v1268_v4 = vmul.f32 %v1264_v48, %v1252_v57 }
 0x663   : > { %v1765_v58 = vpack.c.bf16 %v1313_v53, %v1311_v51  ;;  %v1202_v59 = vpop.permute.xlu1 %1201  ;;  %v1248_v60 = vpop.permute.xlu0 %1247  ;;  %v1766_v61 = vpack.c.bf16 %v1314_v54, %v1312_v52 }
 0x664   : > { %v1251_v0 = vsel %vm1249_vm14, %v1244_v25, %v1248_v60  ;;  %v1253_v2 = vsel %vm1249_vm14, %v1248_v60, %v1244_v25  ;;  %v1206_v10 = vsel %vm1205_vm15, %v1198_v23, %v1202_v59  ;;  %v1208_v11 = vsel %vm1205_vm15, %v1202_v59, %v1198_v23  ;;  %v1698_v25 = vld [vmem:[%s2198_s1 + $0x3] ss:$8 sm:$0x3] }
 0x665   : > { %v1269_v5 = vmul.f32 %v1260_v47, %v1251_v0  ;;  %v1270_v8 = vmul.f32 %v1264_v48, %v1253_v2  ;;  %1433 = vmatprep.subr.bf16.mxu1 %v1766_v61  ;;  %v1223_v21 = vmul.f32 %v1216_v62, %v1206_v10  ;;  %v1224_v1 = vmul.f32 %v1220_v63, %v1208_v11  ;;  %v1695_v48 = vld [vmem:[%s2198_s1 + $0x2] ss:$8 sm:$0x3]  ;;  %v1692_v61 = vld [vmem:[%s2198_s1 + $0x1] ss:$8 sm:$0x3] }
 0x666   : > { %1434 = vmatpush1.bf16.msra.mxu1 %v1765_v58  ;;  %v1128_v7 = vrot.slane %v1698_v25, %v2048_v24  ;;  %v1132_v43 = vrot.slane %v1698_v25, %v2050_v38  ;;  %v1084_v54 = vrot.slane %v1695_v48, %v2048_v24  ;;  %v1088_v55 = vrot.slane %v1695_v48, %v2050_v38 }
 0x667   : > { %v1763_v12 = vpack.c.bf16 %v1269_v5, %v1267_v3  ;;  %v1158_v13 = vpop.permute.xlu1 %1157  ;;  %v1204_v14 = vpop.permute.xlu0 %1203  ;;  %v1764_v15 = vpack.c.bf16 %v1270_v8, %v1268_v4  ;;  %v1040_v4 = vrot.slane %v1692_v61, %v2048_v24  ;;  %v1044_v5 = vrot.slane %v1692_v61, %v2050_v38 }
 0x668   : > { %v1207_v19 = vsel %vm1205_vm15, %v2028_v27, %v1204_v14  ;;  %v1209_v20 = vsel %vm1205_vm15, %v1204_v14, %v2028_v27  ;;  %v1162_v32 = vsel %vm1161_vm0, %v2026_v26, %v1158_v13  ;;  %v1164_v35 = vsel %vm1161_vm0, %v1158_v13, %v2026_v26  ;;  %v991_v13 = vld [vmem:[%s2198_s1] ss:$8 sm:$0x3] }
 0x669   : > { %v1225_v22 = vmul.f32 %v1216_v62, %v1207_v19  ;;  %v1226_v23 = vmul.f32 %v1220_v63, %v1209_v20  ;;  %1435 = vmatprep.subr.bf16.mxu1 %v1764_v15  ;;  %v1179_v26 = vmul.f32 %v1172_v16, %v1162_v32  ;;  %v1180_v45 = vmul.f32 %v1176_v17, %v1164_v35 }
 0x66a   : > { %1436 = vmatpush1.bf16.msra.mxu1 %v1763_v12  ;;  %v996_v20 = vrot.slane %v991_v13, %v2048_v24 }
 0x66b   : > { %v1761_v39 = vpack.c.bf16 %v1225_v22, %v1223_v21  ;;  %v1114_v27 = vpop.permute.xlu1 %1113  ;;  %v1160_v40 = vpop.permute.xlu0 %1159  ;;  %v1762_v42 = vpack.c.bf16 %v1226_v23, %v1224_v1  ;;  %v1000_v21 = vrot.slane %v991_v13, %v2050_v38 }
 0x66c   : > { %v1163_v44 = vsel %vm1161_vm0, %v2032_v29, %v1160_v40  ;;  %v1165_v6 = vsel %vm1161_vm0, %v1160_v40, %v2032_v29  ;;  %v1118_v49 = vsel %vm1117_vm1, %v2030_v28, %v1114_v27  ;;  %v1120_v50 = vsel %vm1117_vm1, %v1114_v27, %v2030_v28 }
 0x66d   : > { %v1181_v46 = vmul.f32 %v1172_v16, %v1163_v44  ;;  %v1182_v47 = vmul.f32 %v1176_v17, %v1165_v6  ;;  %1437 = vmatprep.subr.bf16.mxu1 %v1762_v42  ;;  %v1135_v28 = vmul.f32 %v1128_v7, %v1120_v50  ;;  %v1136_v58 = vmul.f32 %v1132_v43, %v1118_v49 }
 0x66e   : > { %1438 = vmatpush1.bf16.msra.mxu1 %v1761_v39 }
 0x66f   : > { %v1759_v51 = vpack.c.bf16 %v1181_v46, %v1179_v26  ;;  %v1070_v29 = vpop.permute.xlu1 %1069  ;;  %v1116_v52 = vpop.permute.xlu0 %1115  ;;  %v1760_v53 = vpack.c.bf16 %v1182_v47, %v1180_v45  ;;  %v1791_v26 = vld [vmem:[%s2205_s8] sm:$0xff]  }
 0x670   : > { %v1119_v56 = vsel %vm1117_vm1, %v2036_v31, %v1116_v52  ;;  %v1121_v57 = vsel %vm1117_vm1, %v1116_v52, %v2036_v31  ;;  %v1074_v62 = vsel %vm1073_vm2, %v2034_v30, %v1070_v29  ;;  %v1076_v63 = vsel %vm1073_vm2, %v1070_v29, %v2034_v30 }
 0x671   : > { %v1137_v59 = vmul.f32 %v1128_v7, %v1121_v57  ;;  %v1138_v60 = vmul.f32 %v1132_v43, %v1119_v56  ;;  %1439 = vmatprep.subr.bf16.mxu1 %v1760_v53  ;;  %v1091_v30 = vmul.f32 %v1084_v54, %v1076_v63  ;;  %v1092_v10 = vmul.f32 %v1088_v55, %v1074_v62 }
 0x672   : > { %1440 = vmatpush1.bf16.msra.mxu1 %v1759_v51 }
 0x673   : > { %v1757_v0 = vpack.c.bf16 %v1137_v59, %v1135_v28  ;;  %v1026_v31 = vpop.permute.xlu1 %1025  ;;  %v1072_v2 = vpop.permute.xlu0 %1071  ;;  %v1758_v3 = vpack.c.bf16 %v1138_v60, %v1136_v58 }
 0x674   : > { %v1075_v8 = vsel %vm1073_vm2, %v2040_v34, %v1072_v2  ;;  %v1077_v9 = vsel %vm1073_vm2, %v1072_v2, %v2040_v34  ;;  %v1030_v14 = vsel %vm1029_vm3, %v2038_v33, %v1026_v31  ;;  %v1032_v15 = vsel %vm1029_vm3, %v1026_v31, %v2038_v33 }
 0x675   : > { %v1093_v11 = vmul.f32 %v1084_v54, %v1077_v9  ;;  %v1094_v12 = vmul.f32 %v1088_v55, %v1075_v8  ;;  %1441 = vmatprep.subr.bf16.mxu1 %v1758_v3  ;;  %v1047_v33 = vmul.f32 %v1040_v4, %v1032_v15  ;;  %v1048_v23 = vmul.f32 %v1044_v5, %v1030_v14  ;;  %v1817_v15 = vld [vmem:[%s1925_s29 + $0x8] sm:$0xff] }
 0x676   : > { %1442 = vmatpush1.bf16.msra.mxu1 %v1757_v0 }
 0x677   : > { %v1755_v16 = vpack.c.bf16 %v1093_v11, %v1091_v30  ;;  %v981_v34 = vpop.permute.xlu1 %980  ;;  %v1028_v17 = vpop.permute.xlu0 %1027  ;;  %v1756_v19 = vpack.c.bf16 %v1094_v12, %v1092_v10  ;;  %v1816_v11 = vld [vmem:[%s1925_s29] sm:$0xff] }
 0x678   : > { %v1031_v1 = vsel %vm1029_vm3, %v2044_v37, %v1028_v17  ;;  %v1033_v22 = vsel %vm1029_vm3, %v1028_v17, %v2044_v37  ;;  %v987_v35 = vsel %vm986_vm4, %v2042_v36, %v981_v34  ;;  %v989_v24 = vsel %vm986_vm4, %v981_v34, %v2042_v36 }
 0x679   : > { %v1049_v25 = vmul.f32 %v1040_v4, %v1033_v22  ;;  %v1050_v32 = vmul.f32 %v1044_v5, %v1031_v1  ;;  %1443 = vmatprep.subr.bf16.mxu1 %v1756_v19  ;;  %v1003_v42 = vmul.f32 %v996_v20, %v989_v24  ;;  %v1004_v7 = vmul.f32 %v1000_v21, %v987_v35  ;;  %v1554_v5 = vld [vmem:[%s2206_s9] sm:$0xf] }
 0x67a   : > { %1444 = vmatpush1.bf16.msra.mxu1 %v1755_v16 }
 0x67b   : > { %v1753_v38 = vpack.c.bf16 %v1049_v25, %v1047_v33  ;;  %v983_v39 = vpop.permute.xlu0 %982  ;;  %v1754_v27 = vpack.c.bf16 %v1050_v32, %v1048_v23 }
 0x67c   : > { %v988_v37 = vsel %vm986_vm4, %v2056_v41, %v983_v39  ;;  %v990_v40 = vsel %vm986_vm4, %v983_v39, %v2056_v41 }
 0x67d   : > { %v1005_v43 = vmul.f32 %v996_v20, %v990_v40  ;;  %v1006_v44 = vmul.f32 %v1000_v21, %v988_v37  ;;  %1445 = vmatprep.subr.bf16.mxu1 %v1754_v27 }
 0x67e   : > { %1446 = vmatpush1.bf16.msra.mxu1 %v1753_v38 }
 0x67f   : > { %v1751_v6 = vpack.c.bf16 %v1005_v43, %v1003_v42  ;;  %v1752_v36 = vpack.c.bf16 %v1006_v44, %v1004_v7 }
 0x681   : > { %1447 = vmatprep.subr.bf16.mxu1 %v1752_v36 }
 0x682   : > { %1448 = vmatpush1.bf16.msra.mxu1 %v1751_v6 }
 0x684   : > { %v1531_v51 = vpop.permute.xlu1 %1530 }
 0x685   : > { %1466 = vmatmul.mubr.bf16.vlgmr.msra.gmra.mxu1 %v1791_v26 }
 0x688   : > { %v1536_v52 = vpop.permute.xlu0 %1535  ;;  %v1560_v8 = vpop.permute.xlu1 %1559 }
 0x696   : > { %v1519_v45 = vpop.f32.mrf.mxu0 }
 0x698   : > { %v1521_v46 = vpop.f32.mrf.mxu0 }
 0x69a   : > { %v1523_v41 = vpop.f32.mrf.mxu0 }
 0x69c   : > { %v1525_v56 = vpop.f32.mrf.mxu0 }
 0x745   : > { %v1467_v47 = vpop.f32.mrf.mxu1 }
 0x746   : > { %v1520_v48 = vadd.f32 %v1519_v45, %v1467_v47 }
 0x747   : > { %v1469_v18 = vpop.f32.mrf.mxu1 }
 0x748   : > { %v1522_v49 = vadd.f32 %v1521_v46, %v1469_v18  ;;  %v1538_v55 = vadd.f32 %v1531_v51, %v1520_v48 }
 0x749   : > { %v1471_v50 = vpop.f32.mrf.mxu1 }
 0x74a   : > { %v1524_v29 = vadd.f32 %v1523_v41, %v1471_v50  ;;  %v1539_v53 = vadd.f32 %v1531_v51, %v1522_v49  ;;  %v1546_v61 = vmul.f32 0.2, %v1538_v55  ;;  %vm1542_vm7 = vcmp.ge.f32.partialorder %v1538_v55, 0.0 }
 0x74b   : > { %v1473_v54 = vpop.f32.mrf.mxu1 }
 0x74c   : > { %v1540_v57 = vadd.f32 %v1536_v52, %v1524_v29  ;;  %v1526_v28 = vadd.f32 %v1525_v56, %v1473_v54  ;;  %v1547_v59 = vmul.f32 0.2, %v1539_v53  ;;  %vm1543_vm6 = vcmp.ge.f32.partialorder %v1539_v53, 0.0 }
 0x74d   : > { %v1550_v2 = vsel %vm1542_vm7, %v1538_v55, %v1546_v61 }
 0x74e   : > { %v1548_v58 = vmul.f32 0.2, %v1540_v57  ;;  %vm1544_vm5 = vcmp.ge.f32.partialorder %v1540_v57, 0.0  ;;  %v1541_v60 = vadd.f32 %v1536_v52, %v1526_v28  ;;  %v1551_v0 = vsel %vm1543_vm6, %v1539_v53, %v1547_v59 }
 0x750   : > { %vm1545_vm8 = vcmp.ge.f32.partialorder %v1541_v60, 0.0  ;;  %v1549_v62 = vmul.f32 0.2, %v1541_v60  ;;  %v1552_v63 = vsel %vm1544_vm5, %v1540_v57, %v1548_v58 }
 0x751   : > { %v1555_v4 = vpack.c.bf16 %v1552_v63, %v1550_v2 }
 0x752   : > { %v1553_v31 = vsel %vm1545_vm8, %v1541_v60, %v1549_v62 }
 0x753   : > { %v1556_v3 = vpack.c.bf16 %v1553_v31, %v1551_v0 }
 0x755   : > { %1579 = vmatprep.subr.bf16.mxu0 %v1556_v3 }
 0x756   : > { %1580 = vmatpush1.bf16.msra.mxu0 %v1555_v4 }
 0x759   : > { %1732 = vmatmul.mubr.msk.bf16.vlgmr.msra.gmra.mxu0 %vm1481_vm12, %v1554_v5 }
 0x819   : > { %v1599_v9 = vpop.f32.mrf.mxu0 }
 0x81a   : > { %v1600_v30 = vadd.f32 %v1599_v9, %v1560_v8 }
 0x81b   : > { %v1601_v10 = vpop.f32.mrf.mxu0 }
 0x81c   : > { %v1606_v12 = vadd.f32 %v1816_v11, %v1600_v30  ;;  %v1602_v13 = vadd.f32 %v1601_v10, %v1560_v8 }
 0x81d   : > { %v1603_v14 = vpop.f32.mrf.mxu0 }
 0x81e   : > { %1608 = vst [vmem:[%s361_s17] sm:$0xff] %v1606_v12  ;;  %v1607_v16 = vadd.f32 %v1817_v15, %v1602_v13 }
 0x81f   : > { %v1604_v34 = vpop.f32.mrf.mxu0 }
 0x820   : > { %1609 = vst [vmem:[%s361_s17 + $0x8] sm:$0xff] %v1607_v16 }
 0x821 PF: > { %s20_s13 = sadd.s32 1, %s1824_s13  }
 0x822   : > { %p17_p4 = scmp.ge.s32.totalorder %s20_s13, 4  }
 0x824   :  { %19 = sbr.rel (!%p17_p4) target bundleno = 1 (0x1), region = 97 }

</bundles_post_ra>
